<compile_context>
chip_gen: v7x
topology: tpu7x:2x2x1
jax: 0.10.0
libtpu: 0.0.40
codegen_flags: <defaults>
</compile_context>

<pallas_src>
import functools
import numpy as np
import jax
import jax.numpy as jnp
from jax import lax
from jax.experimental import pallas as pl
from jax.experimental.pallas import tpu as pltpu

INV_SQRT2 = float(1.0 / np.sqrt(2.0))


# ------------------------------------------------------------------ helpers --

def _shift_lanes(x, off):
    """out[:, p] = x[:, p + off] if 0 <= p + off < N else 0   (static `off`)."""
    if off == 0:
        return x
    c, n = x.shape
    pad = jnp.zeros((c, abs(off)), x.dtype)
    if off > 0:
        return jnp.concatenate([x[:, off:], pad], axis=1)
    return jnp.concatenate([pad, x[:, :n + off]], axis=1)


def _conv3x3_taps(x, H, W):
    """3x3 'same'-conv taps of x laid out (C, H*W), spatial flattened on lanes.

    Yields (k, tap_k) with k = 3*kh + kw and
      tap_k[:, h*W + w] = x[:, (h+kh-1)*W + (w+kw-1)]   (zero outside the image).
    Vertical out-of-range taps are handled by the zero-filled shift; only the
    horizontal row-wrap needs a lane mask.
    """
    n = x.shape[1]
    lane = lax.broadcasted_iota(jnp.int32, (1, n), 1)
    wi = lane % W
    zero = jnp.zeros_like(x)
    for kh in range(3):
        for kw in range(3):
            dh, dw = kh - 1, kw - 1
            shifted = _shift_lanes(x, dh * W + dw)
            if dw == 0:
                tap = shifted
            else:
                ok = (wi >= -dw) if dw < 0 else (wi < W - dw)
                tap = jnp.where(ok, shifted, zero)
            yield 3 * kh + kw, tap


# ------------------------------------------------------------------ kernels --

def _conv3x3_kernel(x_ref, w_ref, b_ref, o_ref, *, H, W):
    """u-branch 3x3 conv (stride 1, pad 1) as one im2col matmul per batch elem.

    x_ref: (1, Cin, H*W) bf16     w_ref: (Cout, 9*Cin) bf16
    b_ref: (Cout, 1) f32          o_ref: (1, Cout, H*W) bf16
    """
    x = x_ref[0].astype(jnp.float32)                              # (Cin, N)
    taps = [tap for _, tap in _conv3x3_taps(x, H, W)]             # 9 x (Cin, N)
    cat = jnp.concatenate(taps, axis=0).astype(jnp.bfloat16)      # im2col (9*Cin, N)
    acc = jnp.dot(w_ref[...], cat, preferred_element_type=jnp.float32)
    o_ref[0] = (acc + b_ref[...]).astype(o_ref.dtype)


def _fused_up_kernel(u_ref, s_ref, w_r_ref, b_r_ref, ln_w_ref, ln_b_ref,
                     w_pi_ref, w_dw_ref, w_sca_ref, b_sca_ref, w_po_ref,
                     o_ref, *, sH, sW):
    """Fused: r(1x1 on concat) -> WithBias LayerNorm -> FeedForward -> residual.

    All activations are (C, N) with N = sH*sW on the lane axis.
    u_ref: (1, c_u, N) bf16   s_ref: (1, c_s, N) bf16   o_ref: (1, out_nc, N) f32
    """
    hdp = w_pi_ref.shape[0] // 2    # hidden dim zero-padded to a sublane multiple

    # --- r: 1x1 conv on channel-concat([u, s])  (single K = c_u + c_s matmul)
    us = jnp.concatenate([u_ref[0].astype(jnp.float32),
                          s_ref[0].astype(jnp.float32)],
                         axis=0).astype(jnp.bfloat16)             # (c_u+c_s, N)
    tT = (jnp.dot(w_r_ref[...], us, preferred_element_type=jnp.float32)
          + b_r_ref[...])                                         # (out_nc, N) f32

    # --- WithBias LayerNorm over channels (sublane reduction; rsqrt on the EUP)
    mu = jnp.mean(tT, axis=0, keepdims=True)
    xc = tT - mu
    var = jnp.mean(xc * xc, axis=0, keepdims=True)
    y = xc * lax.rsqrt(var + 1e-5) * ln_w_ref[...] + ln_b_ref[...]

    # --- FeedForward.project_in (1x1, no bias): both halves in one matmul
    pin = jnp.dot(w_pi_ref[...], y.astype(jnp.bfloat16),
                  preferred_element_type=jnp.float32)             # (2*hdp, N)

    # --- depthwise 3x3 (padding=1, no bias), gate+value halves in a single pass
    wd = w_dw_ref[...]                                            # (2*hdp, 9) f32
    acc = jnp.zeros_like(pin)
    for k, tap in _conv3x3_taps(pin, sH, sW):
        acc = acc + tap * wd[:, k:k + 1]

    # --- gated exact (erf) GELU:  gelu(x1) * x2
    x1 = acc[:hdp, :]
    x2 = acc[hdp:, :]
    g = (0.5 * x1 * (1.0 + lax.erf(x1 * INV_SQRT2))) * x2

    # --- simplified channel attention: spatial mean (lane reduce) + 1x1 conv
    pooled = jnp.mean(g, axis=1, keepdims=True)                   # (hdp, 1)
    sca = (jnp.dot(w_sca_ref[...].astype(jnp.float32), pooled,
                   preferred_element_type=jnp.float32) + b_sca_ref[...])
    g = g * sca

    # --- project_out (1x1, no bias) + residual; lane-dense (out_nc, N) store
    oT = jnp.dot(w_po_ref[...], g.astype(jnp.bfloat16),
                 preferred_element_type=jnp.float32)
    o_ref[0] = tT + oT


# ----------------------------------------------------------------- wrappers --

def _full_spec(a):
    nd = a.ndim
    return pl.BlockSpec(a.shape, lambda b, _nd=nd: (0,) * _nd)


def conv3x3_pallas(x_flat, w_cat, b_u, H, W):
    B, Cin, N = x_flat.shape
    Cout = w_cat.shape[0]
    kern = functools.partial(_conv3x3_kernel, H=H, W=W)
    return pl.pallas_call(
        kern,
        out_shape=jax.ShapeDtypeStruct((B, Cout, N), jnp.bfloat16),
        grid_spec=pltpu.PrefetchScalarGridSpec(
            num_scalar_prefetch=0,
            grid=(B,),
            in_specs=[pl.BlockSpec((1, Cin, N), lambda b: (b, 0, 0)),
                      _full_spec(w_cat), _full_spec(b_u)],
            out_specs=pl.BlockSpec((1, Cout, N), lambda b: (b, 0, 0)),
        ),
        compiler_params=pltpu.CompilerParams(dimension_semantics=("parallel",)),
    )(x_flat, w_cat, b_u)


def fused_up_pallas(u, s, kp, sH, sW):
    # TODO(synk): for large resolutions on v7x, tile the spatial (lane) axis with
    # a one-row halo and make the SCA pooling a two-pass reduction; whole-image
    # blocks exceed v7x's 64 MiB VMEM there.
    B, c_u, N = u.shape
    c_s = s.shape[1]
    out_nc = kp["w_r"].shape[0]
    kern = functools.partial(_fused_up_kernel, sH=sH, sW=sW)
    args = (u, s, kp["w_r"], kp["b_r"], kp["ln_w"], kp["ln_b"],
            kp["w_pi"], kp["w_dw"], kp["w_sca"], kp["b_sca"], kp["w_po"])
    in_specs = ([pl.BlockSpec((1, c_u, N), lambda b: (b, 0, 0)),
                 pl.BlockSpec((1, c_s, N), lambda b: (b, 0, 0))]
                + [_full_spec(a) for a in args[2:]])
    return pl.pallas_call(
        kern,
        out_shape=jax.ShapeDtypeStruct((B, out_nc, N), jnp.float32),
        grid_spec=pltpu.PrefetchScalarGridSpec(
            num_scalar_prefetch=0,
            grid=(B,),
            in_specs=in_specs,
            out_specs=pl.BlockSpec((1, out_nc, N), lambda b: (b, 0, 0)),
        ),
        compiler_params=pltpu.CompilerParams(dimension_semantics=("parallel",)),
    )(*args)


def up_v2_forward(x_nchw, s_nchw, kp):
    """Full up_v2 forward.  x: (B, in_nc, H, W), s: (B, in_nc//2, sH, sW) NCHW."""
    B, Cin, H, W = x_nchw.shape
    _, c_s, sH, sW = s_nchw.shape
    out_nc = kp["w_r"].shape[0]

    x = x_nchw.reshape(B, Cin, H * W).astype(jnp.bfloat16)
    u = conv3x3_pallas(x, kp["w_u"], kp["b_u"], H, W)          # (B, 2*Cin, H*W) bf16

    # PixelShuffle(2) + crop: pure NCHW index glue (XLA), then flatten spatial.
    # TODO(synk): fold the pixel shuffle into the kernels (needs a strided VMEM
    # scatter) to remove this HBM round-trip of `u`.
    c_ps = (2 * Cin) // 4
    u = u.reshape(B, c_ps, 2, 2, H, W)
    u = jnp.transpose(u, (0, 1, 4, 2, 5, 3)).reshape(B, c_ps, 2 * H, 2 * W)
    u = u[:, :, :sH, :sW].reshape(B, c_ps, sH * sW)

    s = s_nchw.reshape(B, c_s, sH * sW).astype(jnp.bfloat16)

    out = fused_up_pallas(u, s, kp, sH, sW)                    # (B, out_nc, sH*sW)
    return out.reshape(B, out_nc, sH, sW)


# ----------------------------------------------------------- params & checks --

def init_params(key, in_nc, out_nc):
    hd = int(out_nc * 2.66)
    ks = jax.random.split(key, 9)

    def rnd(k, shape, scale=0.1):
        return scale * jax.random.normal(k, shape, jnp.float32)

    return {
        # u: Conv2d(in_nc, 2*in_nc, 3, pad=1)  -- stored (kh*kw, Cin, Cout)
        "w_u": rnd(ks[0], (9, in_nc, 2 * in_nc)),
        "b_u": rnd(ks[1], (2 * in_nc,)),
        # r: Conv2d(in_nc, out_nc, 1)
        "w_r": rnd(ks[2], (in_nc, out_nc)),
        "b_r": rnd(ks[3], (out_nc,)),
        # LayerNorm (WithBias) — PyTorch init (ones / zeros)
        "ln_w": jnp.ones((out_nc,), jnp.float32),
        "ln_b": jnp.zeros((out_nc,), jnp.float32),
        # FeedForward(dim=out_nc, expansion=2.66, bias=False)
        "w_pi": rnd(ks[4], (out_nc, 2 * hd)),      # project_in 1x1, no bias
        "w_dw": rnd(ks[5], (9, 2 * hd)),           # depthwise 3x3 (kh*kw, C), no bias
        "w_sca": rnd(ks[6], (hd, hd)),             # sca 1x1 conv
        "b_sca": rnd(ks[7], (hd,)),
        "w_po": rnd(ks[8], (hd, out_nc)),          # project_out 1x1, no bias
    }


def prepare_kernel_params(p):
    """Repack logical (PyTorch-layout) params into kernel layouts: channels-first
    (C_out, C_in) matmul weights, FF hidden dim zero-padded to a sublane multiple,
    matmul weights in bf16 (per-channel biases / LN / dw taps stay f32)."""
    in_nc = p["w_u"].shape[1]
    out_nc = p["w_r"].shape[1]
    hd2 = p["w_pi"].shape[1]
    hd = hd2 // 2
    hdp = ((hd + 7) // 8) * 8

    kp = {
        "w_u": p["w_u"].reshape(9 * in_nc, 2 * in_nc).T.astype(jnp.bfloat16),
        "b_u": p["b_u"].reshape(2 * in_nc, 1),
        "w_r": p["w_r"].T.astype(jnp.bfloat16),
        "b_r": p["b_r"].reshape(out_nc, 1),
        "ln_w": p["ln_w"].reshape(out_nc, 1),
        "ln_b": p["ln_b"].reshape(out_nc, 1),
    }

    w_pi_t = p["w_pi"].T                       # (2*hd, out_nc): gate rows then value rows
    w_pi = jnp.zeros((2 * hdp, out_nc), jnp.float32)
    w_pi = w_pi.at[:hd].set(w_pi_t[:hd]).at[hdp:hdp + hd].set(w_pi_t[hd:])
    kp["w_pi"] = w_pi.astype(jnp.bfloat16)

    w_dw_t = p["w_dw"].T                       # (2*hd, 9)
    w_dw = jnp.zeros((2 * hdp, 9), jnp.float32)
    w_dw = w_dw.at[:hd].set(w_dw_t[:hd]).at[hdp:hdp + hd].set(w_dw_t[hd:])
    kp["w_dw"] = w_dw

    w_sca = jnp.zeros((hdp, hdp), jnp.float32).at[:hd, :hd].set(p["w_sca"].T)
    kp["w_sca"] = w_sca.astype(jnp.bfloat16)
    kp["b_sca"] = jnp.zeros((hdp, 1), jnp.float32).at[:hd, 0].set(p["b_sca"])

    w_po = jnp.zeros((out_nc, hdp), jnp.float32).at[:, :hd].set(p["w_po"].T)
    kp["w_po"] = w_po.astype(jnp.bfloat16)
    return kp


def reference_forward(x_nchw, s_nchw, p):
    """Pure-JAX reference mirroring the PyTorch forward; inputs / matmul weights
    are rounded to bf16 exactly like the kernel path sees them."""
    def q(a):
        return a.astype(jnp.bfloat16).astype(jnp.float32)

    x = jnp.transpose(q(x_nchw.astype(jnp.float32)), (0, 2, 3, 1))    # NHWC
    s = jnp.transpose(q(s_nchw.astype(jnp.float32)), (0, 2, 3, 1))
    B, H, W, Cin = x.shape

    w_u = q(p["w_u"]).reshape(3, 3, Cin, 2 * Cin)
    u = lax.conv_general_dilated(x, w_u, (1, 1), ((1, 1), (1, 1)),
                                 dimension_numbers=("NHWC", "HWIO", "NHWC")) + p["b_u"]
    u = q(u)                                   # kernel writes u in bf16
    c_ps = (2 * Cin) // 4
    u = u.reshape(B, H, W, c_ps, 2, 2)
    u = jnp.transpose(u, (0, 1, 4, 2, 5, 3)).reshape(B, 2 * H, 2 * W, c_ps)
    sH, sW = s.shape[1], s.shape[2]
    u = u[:, :sH, :sW, :]

    cat = jnp.concatenate([u, s], axis=-1)
    t = jnp.einsum("bhwc,cd->bhwd", cat, q(p["w_r"])) + p["b_r"]

    mu = jnp.mean(t, axis=-1, keepdims=True)
    var = jnp.mean((t - mu) ** 2, axis=-1, keepdims=True)
    y = (t - mu) / jnp.sqrt(var + 1e-5) * p["ln_w"] + p["ln_b"]

    pin = jnp.einsum("bhwc,cd->bhwd", y, q(p["w_pi"]))
    hd2 = p["w_pi"].shape[-1]
    hd = hd2 // 2
    w_dw = p["w_dw"].reshape(3, 3, 1, hd2)
    d = lax.conv_general_dilated(pin, w_dw, (1, 1), ((1, 1), (1, 1)),
                                 dimension_numbers=("NHWC", "HWIO", "NHWC"),
                                 feature_group_count=hd2)
    x1, x2 = d[..., :hd], d[..., hd:]
    g = jax.nn.gelu(x1, approximate=False) * x2
    pooled = jnp.mean(g, axis=(1, 2), keepdims=True)
    sca = jnp.einsum("bhwc,cd->bhwd", pooled, q(p["w_sca"])) + p["b_sca"]
    g = g * sca
    o = jnp.einsum("bhwc,cd->bhwd", g, q(p["w_po"]))
    return jnp.transpose(t + o, (0, 3, 1, 2))


# --------------------------------------------------------------------- main --

if __name__ == "__main__":
    in_nc, out_nc = 8, 8
    B, H, W = 2, 8, 8

    key = jax.random.PRNGKey(0)
    k1, k2, k3 = jax.random.split(key, 3)
    x = jax.random.normal(k1, (B, in_nc, H, W), jnp.float32)           # NCHW, like PyTorch
    s = jax.random.normal(k2, (B, in_nc // 2, 2 * H, 2 * W), jnp.float32)
    params = init_params(k3, in_nc, out_nc)
    kparams = prepare_kernel_params(params)

    fwd = jax.jit(up_v2_forward)
    out = jax.block_until_ready(fwd(x, s, kparams))

    assert out.shape == (B, out_nc, 2 * H, 2 * W), out.shape

    ref = reference_forward(x, s, params)
    np.testing.assert_allclose(np.asarray(out), np.asarray(ref), atol=2e-3, rtol=2e-3)

    print("KERNEL_OK")
</pallas_src>

<mosaic_0001>
module attributes {stable_mosaic.version = 11 : i64} {
  func.func @_conv3x3_kernel(%arg0: i32, %arg1: memref<1x8x64xbf16, #tpu.memory_space<vmem>>, %arg2: memref<16x72xbf16, #tpu.memory_space<vmem>>, %arg3: memref<16x1xf32, #tpu.memory_space<vmem>>, %arg4: memref<1x16x64xbf16, #tpu.memory_space<vmem>>) attributes {dimension_semantics = [#tpu.dimension_semantics<parallel>], iteration_bounds = array<i64: 2>, scalar_prefetch = 0 : i64, scratch_operands = 0 : i64, tpu.core_type = #tpu.core_type<tc>, window_params = [{transform_indices = @transform_0, window_bounds = array<i64: 1, 8, 64>}, {pipeline_mode = #tpu.pipeline_mode<synchronous>, transform_indices = @transform_1, window_bounds = array<i64: 16, 72>}, {pipeline_mode = #tpu.pipeline_mode<synchronous>, transform_indices = @transform_2, window_bounds = array<i64: 16, 1>}, {transform_indices = @transform_3, window_bounds = array<i64: 1, 16, 64>}]} {
    %c0 = arith.constant 0 : index
    %c0_0 = arith.constant 0 : index
    %c0_1 = arith.constant 0 : index
    %0 = vector.load %arg1[%c0, %c0_0, %c0_1] : memref<1x8x64xbf16, #tpu.memory_space<vmem>>, vector<1x8x64xbf16>
    %1 = vector.shape_cast %0 : vector<1x8x64xbf16> to vector<8x64xbf16>
    %2 = arith.extf %1 : vector<8x64xbf16> to vector<8x64xf32>
    %3 = tpu.iota {dimensions = array<i32: 1>} : vector<1x64xi32>
    %c8_i32 = arith.constant 8 : i32
    %c0_i32 = arith.constant 0 : i32
    %4 = arith.cmpi eq, %c8_i32, %c0_i32 : i32
    %c1_i32 = arith.constant 1 : i32
    %5 = arith.select %4, %c1_i32, %c8_i32 : i32
    %6 = vector.broadcast %5 : i32 to vector<1x64xi32>
    %7 = arith.remsi %3, %6 : vector<1x64xi32>
    %c0_i32_2 = arith.constant 0 : i32
    %8 = vector.broadcast %c0_i32_2 : i32 to vector<1x64xi32>
    %9 = arith.cmpi ne, %7, %8 : vector<1x64xi32>
    %c0_i32_3 = arith.constant 0 : i32
    %10 = vector.broadcast %c0_i32_3 : i32 to vector<1x64xi32>
    %11 = arith.cmpi slt, %7, %10 : vector<1x64xi32>
    %c0_i32_4 = arith.constant 0 : i32
    %12 = arith.cmpi slt, %5, %c0_i32_4 : i32
    %13 = vector.broadcast %12 : i1 to vector<1x64xi1>
    %14 = vector.broadcast %13 : vector<1x64xi1> to vector<1x64xi1>
    %15 = arith.xori %11, %14 : vector<1x64xi1>
    %16 = arith.andi %15, %9 : vector<1x64xi1>
    %17 = vector.broadcast %5 : i32 to vector<1x64xi32>
    %18 = arith.addi %7, %17 : vector<1x64xi32>
    %19 = arith.select %16, %18, %7 : vector<1x64xi1>, vector<1x64xi32>
    %cst = arith.constant 0.000000e+00 : f32
    %20 = vector.broadcast %cst : f32 to vector<8x64xf32>
    %cst_5 = arith.constant 0.000000e+00 : f32
    %21 = vector.broadcast %cst_5 : f32 to vector<8x9xf32>
    %22 = vector.extract_strided_slice %2 {offsets = [0, 0], sizes = [8, 55], strides = [1, 1]} : vector<8x64xf32> to vector<8x55xf32>
    %23 = tpu.concatenate %21, %22 in 1 : vector<8x9xf32>, vector<8x55xf32> -> vector<8x64xf32>
    %c1_i32_6 = arith.constant 1 : i32
    %24 = vector.broadcast %c1_i32_6 : i32 to vector<1x64xi32>
    %25 = arith.cmpi sge, %19, %24 : vector<1x64xi32>
    %26 = vector.shape_cast %25 : vector<1x64xi1> to vector<1x64xi1>
    %27 = vector.broadcast %26 : vector<1x64xi1> to vector<8x64xi1>
    %28 = arith.select %27, %23, %20 : vector<8x64xi1>, vector<8x64xf32>
    %cst_7 = arith.constant 0.000000e+00 : f32
    %29 = vector.broadcast %cst_7 : f32 to vector<8x8xf32>
    %30 = vector.extract_strided_slice %2 {offsets = [0, 0], sizes = [8, 56], strides = [1, 1]} : vector<8x64xf32> to vector<8x56xf32>
    %31 = tpu.concatenate %29, %30 in 1 : vector<8x8xf32>, vector<8x56xf32> -> vector<8x64xf32>
    %cst_8 = arith.constant 0.000000e+00 : f32
    %32 = vector.broadcast %cst_8 : f32 to vector<8x7xf32>
    %33 = vector.extract_strided_slice %2 {offsets = [0, 0], sizes = [8, 57], strides = [1, 1]} : vector<8x64xf32> to vector<8x57xf32>
    %34 = tpu.concatenate %32, %33 in 1 : vector<8x7xf32>, vector<8x57xf32> -> vector<8x64xf32>
    %c7_i32 = arith.constant 7 : i32
    %35 = vector.broadcast %c7_i32 : i32 to vector<1x64xi32>
    %36 = arith.cmpi slt, %19, %35 : vector<1x64xi32>
    %37 = vector.shape_cast %36 : vector<1x64xi1> to vector<1x64xi1>
    %38 = vector.broadcast %37 : vector<1x64xi1> to vector<8x64xi1>
    %39 = arith.select %38, %34, %20 : vector<8x64xi1>, vector<8x64xf32>
    %cst_9 = arith.constant 0.000000e+00 : f32
    %40 = vector.broadcast %cst_9 : f32 to vector<8x1xf32>
    %41 = vector.extract_strided_slice %2 {offsets = [0, 0], sizes = [8, 63], strides = [1, 1]} : vector<8x64xf32> to vector<8x63xf32>
    %42 = tpu.concatenate %40, %41 in 1 : vector<8x1xf32>, vector<8x63xf32> -> vector<8x64xf32>
    %c1_i32_10 = arith.constant 1 : i32
    %43 = vector.broadcast %c1_i32_10 : i32 to vector<1x64xi32>
    %44 = arith.cmpi sge, %19, %43 : vector<1x64xi32>
    %45 = vector.shape_cast %44 : vector<1x64xi1> to vector<1x64xi1>
    %46 = vector.broadcast %45 : vector<1x64xi1> to vector<8x64xi1>
    %47 = arith.select %46, %42, %20 : vector<8x64xi1>, vector<8x64xf32>
    %cst_11 = arith.constant 0.000000e+00 : f32
    %48 = vector.broadcast %cst_11 : f32 to vector<8x1xf32>
    %49 = vector.extract_strided_slice %2 {offsets = [0, 1], sizes = [8, 63], strides = [1, 1]} : vector<8x64xf32> to vector<8x63xf32>
    %50 = tpu.concatenate %49, %48 in 1 : vector<8x63xf32>, vector<8x1xf32> -> vector<8x64xf32>
    %c7_i32_12 = arith.constant 7 : i32
    %51 = vector.broadcast %c7_i32_12 : i32 to vector<1x64xi32>
    %52 = arith.cmpi slt, %19, %51 : vector<1x64xi32>
    %53 = vector.shape_cast %52 : vector<1x64xi1> to vector<1x64xi1>
    %54 = vector.broadcast %53 : vector<1x64xi1> to vector<8x64xi1>
    %55 = arith.select %54, %50, %20 : vector<8x64xi1>, vector<8x64xf32>
    %cst_13 = arith.constant 0.000000e+00 : f32
    %56 = vector.broadcast %cst_13 : f32 to vector<8x7xf32>
    %57 = vector.extract_strided_slice %2 {offsets = [0, 7], sizes = [8, 57], strides = [1, 1]} : vector<8x64xf32> to vector<8x57xf32>
    %58 = tpu.concatenate %57, %56 in 1 : vector<8x57xf32>, vector<8x7xf32> -> vector<8x64xf32>
    %c1_i32_14 = arith.constant 1 : i32
    %59 = vector.broadcast %c1_i32_14 : i32 to vector<1x64xi32>
    %60 = arith.cmpi sge, %19, %59 : vector<1x64xi32>
    %61 = vector.shape_cast %60 : vector<1x64xi1> to vector<1x64xi1>
    %62 = vector.broadcast %61 : vector<1x64xi1> to vector<8x64xi1>
    %63 = arith.select %62, %58, %20 : vector<8x64xi1>, vector<8x64xf32>
    %cst_15 = arith.constant 0.000000e+00 : f32
    %64 = vector.broadcast %cst_15 : f32 to vector<8x8xf32>
    %65 = vector.extract_strided_slice %2 {offsets = [0, 8], sizes = [8, 56], strides = [1, 1]} : vector<8x64xf32> to vector<8x56xf32>
    %66 = tpu.concatenate %65, %64 in 1 : vector<8x56xf32>, vector<8x8xf32> -> vector<8x64xf32>
    %cst_16 = arith.constant 0.000000e+00 : f32
    %67 = vector.broadcast %cst_16 : f32 to vector<8x9xf32>
    %68 = vector.extract_strided_slice %2 {offsets = [0, 9], sizes = [8, 55], strides = [1, 1]} : vector<8x64xf32> to vector<8x55xf32>
    %69 = tpu.concatenate %68, %67 in 1 : vector<8x55xf32>, vector<8x9xf32> -> vector<8x64xf32>
    %c7_i32_17 = arith.constant 7 : i32
    %70 = vector.broadcast %c7_i32_17 : i32 to vector<1x64xi32>
    %71 = arith.cmpi slt, %19, %70 : vector<1x64xi32>
    %72 = vector.shape_cast %71 : vector<1x64xi1> to vector<1x64xi1>
    %73 = vector.broadcast %72 : vector<1x64xi1> to vector<8x64xi1>
    %74 = arith.select %73, %69, %20 : vector<8x64xi1>, vector<8x64xf32>
    %75 = tpu.concatenate %28, %31, %39, %47, %2, %55, %63, %66, %74 in 0 : vector<8x64xf32>, vector<8x64xf32>, vector<8x64xf32>, vector<8x64xf32>, vector<8x64xf32>, vector<8x64xf32>, vector<8x64xf32>, vector<8x64xf32>, vector<8x64xf32> -> vector<72x64xf32>
    %76 = arith.truncf %75 : vector<72x64xf32> to vector<72x64xbf16>
    %c0_18 = arith.constant 0 : index
    %c0_19 = arith.constant 0 : index
    %77 = vector.load %arg2[%c0_18, %c0_19] : memref<16x72xbf16, #tpu.memory_space<vmem>>, vector<16x72xbf16>
    %cst_20 = arith.constant dense<0.000000e+00> : vector<16x64xf32>
    %78 = tpu.matmul %77, %76, %cst_20 {dimension_numbers = #tpu.dot_dimension_numbers<[1], [0], [0], [1], [0, 0, 1, 1], [], []>} : vector<16x72xbf16>, vector<72x64xbf16>, vector<16x64xf32> -> vector<16x64xf32>
    %c0_21 = arith.constant 0 : index
    %c0_22 = arith.constant 0 : index
    %79 = vector.load %arg3[%c0_21, %c0_22] : memref<16x1xf32, #tpu.memory_space<vmem>>, vector<16x1xf32>
    %80 = vector.broadcast %79 : vector<16x1xf32> to vector<16x64xf32>
    %81 = arith.addf %78, %80 : vector<16x64xf32>
    %82 = arith.truncf %81 : vector<16x64xf32> to vector<16x64xbf16>
    %c0_23 = arith.constant 0 : index
    %c0_24 = arith.constant 0 : index
    %c0_25 = arith.constant 0 : index
    %83 = vector.load %arg4[%c0_23, %c0_24, %c0_25] : memref<1x16x64xbf16, #tpu.memory_space<vmem>>, vector<1x16x64xbf16>
    %84 = vector.shape_cast %83 : vector<1x16x64xbf16> to vector<16x64xbf16>
    %85 = vector.shape_cast %82 : vector<16x64xbf16> to vector<1x16x64xbf16>
    tpu.vector_store %arg4[%c0_23, %c0_24, %c0_25], %85 {strides = array<i32>} : memref<1x16x64xbf16, #tpu.memory_space<vmem>>, vector<1x16x64xbf16>,
    return
  }
  func.func @transform_0(%arg0: i32) -> (i32, i32, i32) {
    %c0_i32 = arith.constant 0 : i32
    %c0_i32_0 = arith.constant 0 : i32
    %c0_i32_1 = arith.constant 0 : i32
    return %arg0, %c0_i32, %c0_i32_0 : i32, i32, i32
  }
  func.func @transform_1(%arg0: i32) -> (i32, i32) {
    %c0_i32 = arith.constant 0 : i32
    %c0_i32_0 = arith.constant 0 : i32
    %c0_i32_1 = arith.constant 0 : i32
    return %c0_i32, %c0_i32_0 : i32, i32
  }
  func.func @transform_2(%arg0: i32) -> (i32, i32) {
    %c0_i32 = arith.constant 0 : i32
    %c0_i32_0 = arith.constant 0 : i32
    %c0_i32_1 = arith.constant 0 : i32
    return %c0_i32, %c0_i32_0 : i32, i32
  }
  func.func @transform_3(%arg0: i32) -> (i32, i32, i32) {
    %c0_i32 = arith.constant 0 : i32
    %c0_i32_0 = arith.constant 0 : i32
    %c0_i32_1 = arith.constant 0 : i32
    return %arg0, %c0_i32, %c0_i32_0 : i32, i32, i32
  }
}

module attributes {stable_mosaic.version = 11 : i64} {
  func.func @_fused_up_kernel(%arg0: i32, %arg1: memref<1x4x256xbf16, #tpu.memory_space<vmem>>, %arg2: memref<1x4x256xbf16, #tpu.memory_space<vmem>>, %arg3: memref<8x8xbf16, #tpu.memory_space<vmem>>, %arg4: memref<8x1xf32, #tpu.memory_space<vmem>>, %arg5: memref<8x1xf32, #tpu.memory_space<vmem>>, %arg6: memref<8x1xf32, #tpu.memory_space<vmem>>, %arg7: memref<48x8xbf16, #tpu.memory_space<vmem>>, %arg8: memref<48x9xf32, #tpu.memory_space<vmem>>, %arg9: memref<24x24xbf16, #tpu.memory_space<vmem>>, %arg10: memref<24x1xf32, #tpu.memory_space<vmem>>, %arg11: memref<8x24xbf16, #tpu.memory_space<vmem>>, %arg12: memref<1x8x256xf32, #tpu.memory_space<vmem>>) attributes {dimension_semantics = [#tpu.dimension_semantics<parallel>], iteration_bounds = array<i64: 2>, scalar_prefetch = 0 : i64, scratch_operands = 0 : i64, tpu.core_type = #tpu.core_type<tc>, window_params = [{transform_indices = @transform_0, window_bounds = array<i64: 1, 4, 256>}, {transform_indices = @transform_1, window_bounds = array<i64: 1, 4, 256>}, {pipeline_mode = #tpu.pipeline_mode<synchronous>, transform_indices = @transform_2, window_bounds = array<i64: 8, 8>}, {pipeline_mode = #tpu.pipeline_mode<synchronous>, transform_indices = @transform_3, window_bounds = array<i64: 8, 1>}, {pipeline_mode = #tpu.pipeline_mode<synchronous>, transform_indices = @transform_4, window_bounds = array<i64: 8, 1>}, {pipeline_mode = #tpu.pipeline_mode<synchronous>, transform_indices = @transform_5, window_bounds = array<i64: 8, 1>}, {pipeline_mode = #tpu.pipeline_mode<synchronous>, transform_indices = @transform_6, window_bounds = array<i64: 48, 8>}, {pipeline_mode = #tpu.pipeline_mode<synchronous>, transform_indices = @transform_7, window_bounds = array<i64: 48, 9>}, {pipeline_mode = #tpu.pipeline_mode<synchronous>, transform_indices = @transform_8, window_bounds = array<i64: 24, 24>}, {pipeline_mode = #tpu.pipeline_mode<synchronous>, transform_indices = @transform_9, window_bounds = array<i64: 24, 1>}, {pipeline_mode = #tpu.pipeline_mode<synchronous>, transform_indices = @transform_10, window_bounds = array<i64: 8, 24>}, {transform_indices = @transform_11, window_bounds = array<i64: 1, 8, 256>}]} {
    %c0 = arith.constant 0 : index
    %c0_0 = arith.constant 0 : index
    %c0_1 = arith.constant 0 : index
    %0 = vector.load %arg1[%c0, %c0_0, %c0_1] : memref<1x4x256xbf16, #tpu.memory_space<vmem>>, vector<1x4x256xbf16>
    %1 = vector.shape_cast %0 : vector<1x4x256xbf16> to vector<4x256xbf16>
    %2 = arith.extf %1 : vector<4x256xbf16> to vector<4x256xf32>
    %c0_2 = arith.constant 0 : index
    %c0_3 = arith.constant 0 : index
    %c0_4 = arith.constant 0 : index
    %3 = vector.load %arg2[%c0_2, %c0_3, %c0_4] : memref<1x4x256xbf16, #tpu.memory_space<vmem>>, vector<1x4x256xbf16>
    %4 = vector.shape_cast %3 : vector<1x4x256xbf16> to vector<4x256xbf16>
    %5 = arith.extf %4 : vector<4x256xbf16> to vector<4x256xf32>
    %6 = tpu.concatenate %2, %5 in 0 : vector<4x256xf32>, vector<4x256xf32> -> vector<8x256xf32>
    %7 = arith.truncf %6 : vector<8x256xf32> to vector<8x256xbf16>
    %c0_5 = arith.constant 0 : index
    %c0_6 = arith.constant 0 : index
    %8 = vector.load %arg3[%c0_5, %c0_6] : memref<8x8xbf16, #tpu.memory_space<vmem>>, vector<8x8xbf16>
    %cst = arith.constant dense<0.000000e+00> : vector<8x256xf32>
    %9 = tpu.matmul %8, %7, %cst {dimension_numbers = #tpu.dot_dimension_numbers<[1], [0], [0], [1], [0, 0, 1, 1], [], []>} : vector<8x8xbf16>, vector<8x256xbf16>, vector<8x256xf32> -> vector<8x256xf32>
    %c0_7 = arith.constant 0 : index
    %c0_8 = arith.constant 0 : index
    %10 = vector.load %arg4[%c0_7, %c0_8] : memref<8x1xf32, #tpu.memory_space<vmem>>, vector<8x1xf32>
    %11 = vector.broadcast %10 : vector<8x1xf32> to vector<8x256xf32>
    %12 = arith.addf %9, %11 : vector<8x256xf32>
    %cst_9 = arith.constant dense<0.000000e+00> : vector<256xf32>
    %13 = vector.multi_reduction <add>, %12, %cst_9 [0] : vector<8x256xf32> to vector<256xf32>
    %14 = vector.shape_cast %13 : vector<256xf32> to vector<1x256xf32>
    %cst_10 = arith.constant 8.000000e+00 : f32
    %15 = vector.broadcast %cst_10 : f32 to vector<1x256xf32>
    %16 = arith.divf %14, %15 : vector<1x256xf32>
    %17 = vector.broadcast %16 : vector<1x256xf32> to vector<8x256xf32>
    %18 = arith.subf %12, %17 : vector<8x256xf32>
    %19 = arith.mulf %18, %18 : vector<8x256xf32>
    %cst_11 = arith.constant dense<0.000000e+00> : vector<256xf32>
    %20 = vector.multi_reduction <add>, %19, %cst_11 [0] : vector<8x256xf32> to vector<256xf32>
    %21 = vector.shape_cast %20 : vector<256xf32> to vector<1x256xf32>
    %cst_12 = arith.constant 8.000000e+00 : f32
    %22 = vector.broadcast %cst_12 : f32 to vector<1x256xf32>
    %23 = arith.divf %21, %22 : vector<1x256xf32>
    %cst_13 = arith.constant 9.99999974E-6 : f32
    %24 = vector.broadcast %cst_13 : f32 to vector<1x256xf32>
    %25 = arith.addf %23, %24 : vector<1x256xf32>
    %26 = math.rsqrt %25 : vector<1x256xf32>
    %27 = vector.broadcast %26 : vector<1x256xf32> to vector<8x256xf32>
    %28 = arith.mulf %18, %27 : vector<8x256xf32>
    %c0_14 = arith.constant 0 : index
    %c0_15 = arith.constant 0 : index
    %29 = vector.load %arg5[%c0_14, %c0_15] : memref<8x1xf32, #tpu.memory_space<vmem>>, vector<8x1xf32>
    %30 = vector.broadcast %29 : vector<8x1xf32> to vector<8x256xf32>
    %31 = arith.mulf %28, %30 : vector<8x256xf32>
    %c0_16 = arith.constant 0 : index
    %c0_17 = arith.constant 0 : index
    %32 = vector.load %arg6[%c0_16, %c0_17] : memref<8x1xf32, #tpu.memory_space<vmem>>, vector<8x1xf32>
    %33 = vector.broadcast %32 : vector<8x1xf32> to vector<8x256xf32>
    %34 = arith.addf %31, %33 : vector<8x256xf32>
    %c0_18 = arith.constant 0 : index
    %c0_19 = arith.constant 0 : index
    %35 = vector.load %arg7[%c0_18, %c0_19] : memref<48x8xbf16, #tpu.memory_space<vmem>>, vector<48x8xbf16>
    %36 = arith.truncf %34 : vector<8x256xf32> to vector<8x256xbf16>
    %cst_20 = arith.constant dense<0.000000e+00> : vector<48x256xf32>
    %37 = tpu.matmul %35, %36, %cst_20 {dimension_numbers = #tpu.dot_dimension_numbers<[1], [0], [0], [1], [0, 0, 1, 1], [], []>} : vector<48x8xbf16>, vector<8x256xbf16>, vector<48x256xf32> -> vector<48x256xf32>
    %c0_21 = arith.constant 0 : index
    %c0_22 = arith.constant 0 : index
    %38 = vector.load %arg8[%c0_21, %c0_22] : memref<48x9xf32, #tpu.memory_space<vmem>>, vector<48x9xf32>
    %cst_23 = arith.constant 0.000000e+00 : f32
    %39 = vector.broadcast %cst_23 : f32 to vector<48x256xf32>
    %40 = tpu.iota {dimensions = array<i32: 1>} : vector<1x256xi32>
    %c16_i32 = arith.constant 16 : i32
    %c0_i32 = arith.constant 0 : i32
    %41 = arith.cmpi eq, %c16_i32, %c0_i32 : i32
    %c1_i32 = arith.constant 1 : i32
    %42 = arith.select %41, %c1_i32, %c16_i32 : i32
    %43 = vector.broadcast %42 : i32 to vector<1x256xi32>
    %44 = arith.remsi %40, %43 : vector<1x256xi32>
    %c0_i32_24 = arith.constant 0 : i32
    %45 = vector.broadcast %c0_i32_24 : i32 to vector<1x256xi32>
    %46 = arith.cmpi ne, %44, %45 : vector<1x256xi32>
    %c0_i32_25 = arith.constant 0 : i32
    %47 = vector.broadcast %c0_i32_25 : i32 to vector<1x256xi32>
    %48 = arith.cmpi slt, %44, %47 : vector<1x256xi32>
    %c0_i32_26 = arith.constant 0 : i32
    %49 = arith.cmpi slt, %42, %c0_i32_26 : i32
    %50 = vector.broadcast %49 : i1 to vector<1x256xi1>
    %51 = vector.broadcast %50 : vector<1x256xi1> to vector<1x256xi1>
    %52 = arith.xori %48, %51 : vector<1x256xi1>
    %53 = arith.andi %52, %46 : vector<1x256xi1>
    %54 = vector.broadcast %42 : i32 to vector<1x256xi32>
    %55 = arith.addi %44, %54 : vector<1x256xi32>
    %56 = arith.select %53, %55, %44 : vector<1x256xi1>, vector<1x256xi32>
    %cst_27 = arith.constant 0.000000e+00 : f32
    %57 = vector.broadcast %cst_27 : f32 to vector<48x256xf32>
    %cst_28 = arith.constant 0.000000e+00 : f32
    %58 = vector.broadcast %cst_28 : f32 to vector<48x17xf32>
    %59 = vector.extract_strided_slice %37 {offsets = [0, 0], sizes = [48, 239], strides = [1, 1]} : vector<48x256xf32> to vector<48x239xf32>
    %60 = tpu.concatenate %58, %59 in 1 : vector<48x17xf32>, vector<48x239xf32> -> vector<48x256xf32>
    %c1_i32_29 = arith.constant 1 : i32
    %61 = vector.broadcast %c1_i32_29 : i32 to vector<1x256xi32>
    %62 = arith.cmpi sge, %56, %61 : vector<1x256xi32>
    %63 = vector.shape_cast %62 : vector<1x256xi1> to vector<1x256xi1>
    %64 = vector.broadcast %63 : vector<1x256xi1> to vector<48x256xi1>
    %65 = arith.select %64, %60, %57 : vector<48x256xi1>, vector<48x256xf32>
    %66 = vector.extract_strided_slice %38 {offsets = [0, 0], sizes = [48, 1], strides = [1, 1]} : vector<48x9xf32> to vector<48x1xf32>
    %67 = vector.broadcast %66 : vector<48x1xf32> to vector<48x256xf32>
    %68 = arith.mulf %65, %67 : vector<48x256xf32>
    %69 = arith.addf %39, %68 : vector<48x256xf32>
    %cst_30 = arith.constant 0.000000e+00 : f32
    %70 = vector.broadcast %cst_30 : f32 to vector<48x16xf32>
    %71 = vector.extract_strided_slice %37 {offsets = [0, 0], sizes = [48, 240], strides = [1, 1]} : vector<48x256xf32> to vector<48x240xf32>
    %72 = tpu.concatenate %70, %71 in 1 : vector<48x16xf32>, vector<48x240xf32> -> vector<48x256xf32>
    %73 = vector.extract_strided_slice %38 {offsets = [0, 1], sizes = [48, 1], strides = [1, 1]} : vector<48x9xf32> to vector<48x1xf32>
    %74 = vector.broadcast %73 : vector<48x1xf32> to vector<48x256xf32>
    %75 = arith.mulf %72, %74 : vector<48x256xf32>
    %76 = arith.addf %69, %75 : vector<48x256xf32>
    %cst_31 = arith.constant 0.000000e+00 : f32
    %77 = vector.broadcast %cst_31 : f32 to vector<48x15xf32>
    %78 = vector.extract_strided_slice %37 {offsets = [0, 0], sizes = [48, 241], strides = [1, 1]} : vector<48x256xf32> to vector<48x241xf32>
    %79 = tpu.concatenate %77, %78 in 1 : vector<48x15xf32>, vector<48x241xf32> -> vector<48x256xf32>
    %c15_i32 = arith.constant 15 : i32
    %80 = vector.broadcast %c15_i32 : i32 to vector<1x256xi32>
    %81 = arith.cmpi slt, %56, %80 : vector<1x256xi32>
    %82 = vector.shape_cast %81 : vector<1x256xi1> to vector<1x256xi1>
    %83 = vector.broadcast %82 : vector<1x256xi1> to vector<48x256xi1>
    %84 = arith.select %83, %79, %57 : vector<48x256xi1>, vector<48x256xf32>
    %85 = vector.extract_strided_slice %38 {offsets = [0, 2], sizes = [48, 1], strides = [1, 1]} : vector<48x9xf32> to vector<48x1xf32>
    %86 = vector.broadcast %85 : vector<48x1xf32> to vector<48x256xf32>
    %87 = arith.mulf %84, %86 : vector<48x256xf32>
    %88 = arith.addf %76, %87 : vector<48x256xf32>
    %cst_32 = arith.constant 0.000000e+00 : f32
    %89 = vector.broadcast %cst_32 : f32 to vector<48x1xf32>
    %90 = vector.extract_strided_slice %37 {offsets = [0, 0], sizes = [48, 255], strides = [1, 1]} : vector<48x256xf32> to vector<48x255xf32>
    %91 = tpu.concatenate %89, %90 in 1 : vector<48x1xf32>, vector<48x255xf32> -> vector<48x256xf32>
    %c1_i32_33 = arith.constant 1 : i32
    %92 = vector.broadcast %c1_i32_33 : i32 to vector<1x256xi32>
    %93 = arith.cmpi sge, %56, %92 : vector<1x256xi32>
    %94 = vector.shape_cast %93 : vector<1x256xi1> to vector<1x256xi1>
    %95 = vector.broadcast %94 : vector<1x256xi1> to vector<48x256xi1>
    %96 = arith.select %95, %91, %57 : vector<48x256xi1>, vector<48x256xf32>
    %97 = vector.extract_strided_slice %38 {offsets = [0, 3], sizes = [48, 1], strides = [1, 1]} : vector<48x9xf32> to vector<48x1xf32>
    %98 = vector.broadcast %97 : vector<48x1xf32> to vector<48x256xf32>
    %99 = arith.mulf %96, %98 : vector<48x256xf32>
    %100 = arith.addf %88, %99 : vector<48x256xf32>
    %101 = vector.extract_strided_slice %38 {offsets = [0, 4], sizes = [48, 1], strides = [1, 1]} : vector<48x9xf32> to vector<48x1xf32>
    %102 = vector.broadcast %101 : vector<48x1xf32> to vector<48x256xf32>
    %103 = arith.mulf %37, %102 : vector<48x256xf32>
    %104 = arith.addf %100, %103 : vector<48x256xf32>
    %cst_34 = arith.constant 0.000000e+00 : f32
    %105 = vector.broadcast %cst_34 : f32 to vector<48x1xf32>
    %106 = vector.extract_strided_slice %37 {offsets = [0, 1], sizes = [48, 255], strides = [1, 1]} : vector<48x256xf32> to vector<48x255xf32>
    %107 = tpu.concatenate %106, %105 in 1 : vector<48x255xf32>, vector<48x1xf32> -> vector<48x256xf32>
    %c15_i32_35 = arith.constant 15 : i32
    %108 = vector.broadcast %c15_i32_35 : i32 to vector<1x256xi32>
    %109 = arith.cmpi slt, %56, %108 : vector<1x256xi32>
    %110 = vector.shape_cast %109 : vector<1x256xi1> to vector<1x256xi1>
    %111 = vector.broadcast %110 : vector<1x256xi1> to vector<48x256xi1>
    %112 = arith.select %111, %107, %57 : vector<48x256xi1>, vector<48x256xf32>
    %113 = vector.extract_strided_slice %38 {offsets = [0, 5], sizes = [48, 1], strides = [1, 1]} : vector<48x9xf32> to vector<48x1xf32>
    %114 = vector.broadcast %113 : vector<48x1xf32> to vector<48x256xf32>
    %115 = arith.mulf %112, %114 : vector<48x256xf32>
    %116 = arith.addf %104, %115 : vector<48x256xf32>
    %cst_36 = arith.constant 0.000000e+00 : f32
    %117 = vector.broadcast %cst_36 : f32 to vector<48x15xf32>
    %118 = vector.extract_strided_slice %37 {offsets = [0, 15], sizes = [48, 241], strides = [1, 1]} : vector<48x256xf32> to vector<48x241xf32>
    %119 = tpu.concatenate %118, %117 in 1 : vector<48x241xf32>, vector<48x15xf32> -> vector<48x256xf32>
    %c1_i32_37 = arith.constant 1 : i32
    %120 = vector.broadcast %c1_i32_37 : i32 to vector<1x256xi32>
    %121 = arith.cmpi sge, %56, %120 : vector<1x256xi32>
    %122 = vector.shape_cast %121 : vector<1x256xi1> to vector<1x256xi1>
    %123 = vector.broadcast %122 : vector<1x256xi1> to vector<48x256xi1>
    %124 = arith.select %123, %119, %57 : vector<48x256xi1>, vector<48x256xf32>
    %125 = vector.extract_strided_slice %38 {offsets = [0, 6], sizes = [48, 1], strides = [1, 1]} : vector<48x9xf32> to vector<48x1xf32>
    %126 = vector.broadcast %125 : vector<48x1xf32> to vector<48x256xf32>
    %127 = arith.mulf %124, %126 : vector<48x256xf32>
    %128 = arith.addf %116, %127 : vector<48x256xf32>
    %cst_38 = arith.constant 0.000000e+00 : f32
    %129 = vector.broadcast %cst_38 : f32 to vector<48x16xf32>
    %130 = vector.extract_strided_slice %37 {offsets = [0, 16], sizes = [48, 240], strides = [1, 1]} : vector<48x256xf32> to vector<48x240xf32>
    %131 = tpu.concatenate %130, %129 in 1 : vector<48x240xf32>, vector<48x16xf32> -> vector<48x256xf32>
    %132 = vector.extract_strided_slice %38 {offsets = [0, 7], sizes = [48, 1], strides = [1, 1]} : vector<48x9xf32> to vector<48x1xf32>
    %133 = vector.broadcast %132 : vector<48x1xf32> to vector<48x256xf32>
    %134 = arith.mulf %131, %133 : vector<48x256xf32>
    %135 = arith.addf %128, %134 : vector<48x256xf32>
    %cst_39 = arith.constant 0.000000e+00 : f32
    %136 = vector.broadcast %cst_39 : f32 to vector<48x17xf32>
    %137 = vector.extract_strided_slice %37 {offsets = [0, 17], sizes = [48, 239], strides = [1, 1]} : vector<48x256xf32> to vector<48x239xf32>
    %138 = tpu.concatenate %137, %136 in 1 : vector<48x239xf32>, vector<48x17xf32> -> vector<48x256xf32>
    %c15_i32_40 = arith.constant 15 : i32
    %139 = vector.broadcast %c15_i32_40 : i32 to vector<1x256xi32>
    %140 = arith.cmpi slt, %56, %139 : vector<1x256xi32>
    %141 = vector.shape_cast %140 : vector<1x256xi1> to vector<1x256xi1>
    %142 = vector.broadcast %141 : vector<1x256xi1> to vector<48x256xi1>
    %143 = arith.select %142, %138, %57 : vector<48x256xi1>, vector<48x256xf32>
    %144 = vector.extract_strided_slice %38 {offsets = [0, 8], sizes = [48, 1], strides = [1, 1]} : vector<48x9xf32> to vector<48x1xf32>
    %145 = vector.broadcast %144 : vector<48x1xf32> to vector<48x256xf32>
    %146 = arith.mulf %143, %145 : vector<48x256xf32>
    %147 = arith.addf %135, %146 : vector<48x256xf32>
    %148 = vector.extract_strided_slice %147 {offsets = [0, 0], sizes = [24, 256], strides = [1, 1]} : vector<48x256xf32> to vector<24x256xf32>
    %149 = vector.extract_strided_slice %147 {offsets = [24, 0], sizes = [24, 256], strides = [1, 1]} : vector<48x256xf32> to vector<24x256xf32>
    %cst_41 = arith.constant 5.000000e-01 : f32
    %150 = vector.broadcast %cst_41 : f32 to vector<24x256xf32>
    %151 = arith.mulf %150, %148 : vector<24x256xf32>
    %cst_42 = arith.constant 0.707106769 : f32
    %152 = vector.broadcast %cst_42 : f32 to vector<24x256xf32>
    %153 = arith.mulf %148, %152 : vector<24x256xf32>
    %154 = math.erf %153 : vector<24x256xf32>
    %cst_43 = arith.constant 1.000000e+00 : f32
    %155 = vector.broadcast %cst_43 : f32 to vector<24x256xf32>
    %156 = arith.addf %155, %154 : vector<24x256xf32>
    %157 = arith.mulf %151, %156 : vector<24x256xf32>
    %158 = arith.mulf %157, %149 : vector<24x256xf32>
    %cst_44 = arith.constant dense<0.000000e+00> : vector<24xf32>
    %159 = vector.multi_reduction <add>, %158, %cst_44 [1] : vector<24x256xf32> to vector<24xf32>
    %160 = vector.shape_cast %159 : vector<24xf32> to vector<24x1xf32>
    %cst_45 = arith.constant 2.560000e+02 : f32
    %161 = vector.broadcast %cst_45 : f32 to vector<24x1xf32>
    %162 = arith.divf %160, %161 : vector<24x1xf32>
    %c0_46 = arith.constant 0 : index
    %c0_47 = arith.constant 0 : index
    %163 = vector.load %arg9[%c0_46, %c0_47] : memref<24x24xbf16, #tpu.memory_space<vmem>>, vector<24x24xbf16>
    %164 = arith.extf %163 : vector<24x24xbf16> to vector<24x24xf32>
    %cst_48 = arith.constant dense<0.000000e+00> : vector<24x1xf32>
    %165 = tpu.matmul %164, %162, %cst_48 {dimension_numbers = #tpu.dot_dimension_numbers<[1], [0], [0], [1], [0, 0, 1, 1], [], []>} : vector<24x24xf32>, vector<24x1xf32>, vector<24x1xf32> -> vector<24x1xf32>
    %c0_49 = arith.constant 0 : index
    %c0_50 = arith.constant 0 : index
    %166 = vector.load %arg10[%c0_49, %c0_50] : memref<24x1xf32, #tpu.memory_space<vmem>>, vector<24x1xf32>
    %167 = arith.addf %165, %166 : vector<24x1xf32>
    %168 = vector.broadcast %167 : vector<24x1xf32> to vector<24x256xf32>
    %169 = arith.mulf %158, %168 : vector<24x256xf32>
    %c0_51 = arith.constant 0 : index
    %c0_52 = arith.constant 0 : index
    %170 = vector.load %arg11[%c0_51, %c0_52] : memref<8x24xbf16, #tpu.memory_space<vmem>>, vector<8x24xbf16>
    %171 = arith.truncf %169 : vector<24x256xf32> to vector<24x256xbf16>
    %cst_53 = arith.constant dense<0.000000e+00> : vector<8x256xf32>
    %172 = tpu.matmul %170, %171, %cst_53 {dimension_numbers = #tpu.dot_dimension_numbers<[1], [0], [0], [1], [0, 0, 1, 1], [], []>} : vector<8x24xbf16>, vector<24x256xbf16>, vector<8x256xf32> -> vector<8x256xf32>
    %173 = arith.addf %12, %172 : vector<8x256xf32>
    %c0_54 = arith.constant 0 : index
    %c0_55 = arith.constant 0 : index
    %c0_56 = arith.constant 0 : index
    %174 = vector.load %arg12[%c0_54, %c0_55, %c0_56] : memref<1x8x256xf32, #tpu.memory_space<vmem>>, vector<1x8x256xf32>
    %175 = vector.shape_cast %174 : vector<1x8x256xf32> to vector<8x256xf32>
    %176 = vector.shape_cast %173 : vector<8x256xf32> to vector<1x8x256xf32>
    tpu.vector_store %arg12[%c0_54, %c0_55, %c0_56], %176 {strides = array<i32>} : memref<1x8x256xf32, #tpu.memory_space<vmem>>, vector<1x8x256xf32>,
    return
  }
  func.func @transform_0(%arg0: i32) -> (i32, i32, i32) {
    %c0_i32 = arith.constant 0 : i32
    %c0_i32_0 = arith.constant 0 : i32
    %c0_i32_1 = arith.constant 0 : i32
    return %arg0, %c0_i32, %c0_i32_0 : i32, i32, i32
  }
  func.func @transform_1(%arg0: i32) -> (i32, i32, i32) {
    %c0_i32 = arith.constant 0 : i32
    %c0_i32_0 = arith.constant 0 : i32
    %c0_i32_1 = arith.constant 0 : i32
    return %arg0, %c0_i32, %c0_i32_0 : i32, i32, i32
  }
  func.func @transform_2(%arg0: i32) -> (i32, i32) {
    %c0_i32 = arith.constant 0 : i32
    %c0_i32_0 = arith.constant 0 : i32
    %c0_i32_1 = arith.constant 0 : i32
    return %c0_i32, %c0_i32_0 : i32, i32
  }
  func.func @transform_3(%arg0: i32) -> (i32, i32) {
    %c0_i32 = arith.constant 0 : i32
    %c0_i32_0 = arith.constant 0 : i32
    %c0_i32_1 = arith.constant 0 : i32
    return %c0_i32, %c0_i32_0 : i32, i32
  }
  func.func @transform_4(%arg0: i32) -> (i32, i32) {
    %c0_i32 = arith.constant 0 : i32
    %c0_i32_0 = arith.constant 0 : i32
    %c0_i32_1 = arith.constant 0 : i32
    return %c0_i32, %c0_i32_0 : i32, i32
  }
  func.func @transform_5(%arg0: i32) -> (i32, i32) {
    %c0_i32 = arith.constant 0 : i32
    %c0_i32_0 = arith.constant 0 : i32
    %c0_i32_1 = arith.constant 0 : i32
    return %c0_i32, %c0_i32_0 : i32, i32
  }
  func.func @transform_6(%arg0: i32) -> (i32, i32) {
    %c0_i32 = arith.constant 0 : i32
    %c0_i32_0 = arith.constant 0 : i32
    %c0_i32_1 = arith.constant 0 : i32
    return %c0_i32, %c0_i32_0 : i32, i32
  }
  func.func @transform_7(%arg0: i32) -> (i32, i32) {
    %c0_i32 = arith.constant 0 : i32
    %c0_i32_0 = arith.constant 0 : i32
    %c0_i32_1 = arith.constant 0 : i32
    return %c0_i32, %c0_i32_0 : i32, i32
  }
  func.func @transform_8(%arg0: i32) -> (i32, i32) {
    %c0_i32 = arith.constant 0 : i32
    %c0_i32_0 = arith.constant 0 : i32
    %c0_i32_1 = arith.constant 0 : i32
    return %c0_i32, %c0_i32_0 : i32, i32
  }
  func.func @transform_9(%arg0: i32) -> (i32, i32) {
    %c0_i32 = arith.constant 0 : i32
    %c0_i32_0 = arith.constant 0 : i32
    %c0_i32_1 = arith.constant 0 : i32
    return %c0_i32, %c0_i32_0 : i32, i32
  }
  func.func @transform_10(%arg0: i32) -> (i32, i32) {
    %c0_i32 = arith.constant 0 : i32
    %c0_i32_0 = arith.constant 0 : i32
    %c0_i32_1 = arith.constant 0 : i32
    return %c0_i32, %c0_i32_0 : i32, i32
  }
  func.func @transform_11(%arg0: i32) -> (i32, i32, i32) {
    %c0_i32 = arith.constant 0 : i32
    %c0_i32_0 = arith.constant 0 : i32
    %c0_i32_1 = arith.constant 0 : i32
    return %arg0, %c0_i32, %c0_i32_0 : i32, i32, i32
  }
}

</mosaic_0001>

<bundles_post_ra>
// kernel: up_v2_forward.2
= control target key start
LH: loop header
LB: loop body
LE: loop exit
PB: predicated region body
PF: predicated region fallthrough
CT: control target
= control target key end

     0   :  { %s490_s12 = smov 0   ;;  %s557_s0 = inlined_call_operand.vmem [shape: bf16[2,8,64], index: 0, kind: input, shape index: {}]   ;;  %s558_s1 = inlined_call_operand.vmem [shape: bf16[16,72], index: 1, kind: input, shape index: {}]   ;;  %s559_s2 = inlined_call_operand.vmem [shape: f32[16,1], index: 2, kind: input, shape index: {}]   ;;  %s560_s3 = inlined_call_operand.vmem [shape: bf16[2,16,64], index: 3, kind: output, shape index: {}]  }
   0x1 LB: > { %s377_s13 = sadd.s32 4294967295, %s456_s12   ;;  %p381_p0 = scmp.ge.s32.totalorder %s456_s12, 1  ;;  %s456_s12 = sphi %s490_s12, %s13_s12  }
   0x2   : > { %p136_p1 = scmp.lt.s32.totalorder %s456_s12, 3 }
   0x4   : > { %p137_p2 = pnand %p381_p0, %p136_p1 }
   0x5   : > { %p159_p3 = scmp.lt.s32.totalorder (!%p137_p2), %s377_s13, 1  ;;  %v458_v0 = vmov (!%p137_p2), 0.0   ;;  %s459_s18 = smov (!%p137_p2), 7   ;;  %vm465_vm0 = vmmov (!%p137_p2), 0   ;;  %v468_v3 = vmov (!%p137_p2), 0   ;;  %v245_v4 = vld [vmem:[%s559_s2] sm:$0xff] (!%p137_p2)  ;;  %v171_v6 = vlaneseq (!%p137_p2) }
   0x6   : > { %140 = sbr.rel (%p137_p2) target bundleno = 378 (0x17a), region = 32  ;;  %413 = vmatprep.subr.bf16.mxu0 (!%p137_p2), %v458_v0  ;;  %s460_s19 = smov (!%p137_p2), 9   ;;  %423 = vmatprep.mubr.msk.bf16.mxu0 (!%p137_p2), %vm465_vm0, %v458_v0  ;;  %v246_v5 = vld [vmem:[%s559_s2 + $0x8] sm:$0xff] (!%p137_p2)  ;;  %vm198_vm1 = vcmask (!%p137_p2), 64512   ;;  %vm189_vm2 = vcmask (!%p137_p2), 72704   ;;  %vm203_vm5 = vcmask (!%p137_p2), 56320  }
   0x7   : > { %s461_s20 = smov (!%p137_p2), 1   ;;  %s462_s21 = smov (!%p137_p2), 8   ;;  %447 = vset.pattern.permute.xlu0 (!%p137_p2), %v468_v3  ;;  %448 = vset.pattern.permute.xlu1 (!%p137_p2), %v468_v3  ;;  %v172_v7 = vand.u32 (!%p137_p2), 127, %v171_v6  ;;  %vm386_vm4 = vmneg (!%p137_p2), %vm198_vm1  ;;  %vm212_vm6 = vcmask (!%p137_p2), 7168   ;;  %vm218_vm9 = vcmask (!%p137_p2), 515072   ;;  %vm235_vm11 = vcmask (!%p137_p2), 449536  }
   0x8   : > { %s463_s22 = smov (!%p137_p2), 127   ;;  %s464_s23 = smov (!%p137_p2), 121   ;;  %vm224_vm12 = vcmask (!%p137_p2), 465920   ;;  %vm469_vm13 = vmmov (!%p137_p2), 1   ;;  %vm230_vm15 = vcmask (!%p137_p2), 457728   ;;  %vm266_vm1 = vcmask (!%p137_p2), 1043456  }
   0x9   : > { %s466_s24 = smov (!%p137_p2), 120   ;;  %s467_s25 = smov (!%p137_p2), 119   ;;  %v177_v8 = vand.u32 (!%p137_p2), 7, %v172_v7  ;;  %v449_v32 = vld [vmem:[%s558_s1] sm:$0xff] (!%p137_p2)  }
   0xb   : > { %vm522_vm3 = vcmp.ge.s32.totalorder (!%p137_p2), %v177_v8, 1  ;;  %vm528_vm8 = vcmp.lt.s32.totalorder (!%p137_p2), %v177_v8, 7 }
   0xc   : > { %vm387_vm7 = vmpackc.low (!%p137_p2), %vm386_vm4, %vm522_vm3 }
   0xd   : > { %s566_s13 = smov (!%p159_p3, %s377_s13), 1  ;;  %vm390_vm10 = vmpackc.low %vm522_vm3, %vm528_vm8 }
   0xe   : > { %s382_s14 = sshll.u32 %s566_s13, 2  ;;  %vm393_vm14 = vmpackc.low %vm528_vm8, %vm469_vm13  ;;  %s404_s5 = sshll.u32 %s566_s13, 3 }
   0xf   : > { %s162_s17 = scalar_lea.vmem %s557_s0, %s382_s14  ;;  %vm396_vm0 = vmpackc.low %vm230_vm15, %vm522_vm3  ;;  %s167_s8 = scalar_lea.vmem %s560_s3, %s404_s5  ;;  %vm319_vm3 = vcmask 519168  }
  0x10   : > { %v169_v1 = vld [vmem:[%s162_s17] sm:$0xf] }
  0x11   : > { %v505_v2 = vunpack.c.l.bf16 %v169_v1 }
  0x13   : > { %200 = vrot.lane.b32.xlu1 %v505_v2, %s459_s18  ;;  %186 = vrot.lane.b32.xlu0 %v505_v2, %s460_s19 }
  0x17   : > { %209 = vrot.lane.b32.xlu1 %v505_v2, %s461_s20  ;;  %195 = vrot.lane.b32.xlu0 %v505_v2, %s462_s21 }
  0x1b   : > { %215 = vrot.lane.b32.xlu0 %v505_v2, %s463_s22  ;;  %221 = vrot.lane.b32.xlu1 %v505_v2, %s464_s23 }
  0x1f   : > { %227 = vrot.lane.b32.xlu0 %v505_v2, %s466_s24  ;;  %232 = vrot.lane.b32.xlu1 %v505_v2, %s467_s25 }
  0x23   : > { %249 = vperm.xlu0 %447, %v245_v4   ;;  %254 = vperm.xlu1 %448, %v246_v5  }
  0x85   : > { %v201_v9 = vpop.permute.xlu1 %200  ;;  %v187_v10 = vpop.permute.xlu0 %186 }
  0x86   : > { %v190_v12 = vsel %vm189_vm2, 0.0, %v187_v10  ;;  %v204_v17 = vsel %vm203_vm5, 0.0, %v201_v9  ;;  %vm262_vm2 = vcmask 588800  }
  0x89   : > { %v210_v13 = vpop.permute.xlu1 %209  ;;  %v196_v14 = vpop.permute.xlu0 %195 }
  0x8a   : > { %v388_v15 = vpack.c.bf16 %v196_v14, %v190_v12  ;;  %v213_v18 = vsel %vm212_vm6, 0.0, %v210_v13 }
  0x8b   : > { %v391_v21 = vpack.c.bf16 %v213_v18, %v204_v17 }
  0x8c   : > { %414 = vmatpush3.bf16.msk.msra.mxu0 %vm387_vm7, %v388_v15 }
  0x8d   : > { %415 = vmatprep.subr.bf16.mxu0 %v458_v0  ;;  %v216_v19 = vpop.permute.xlu0 %215  ;;  %v222_v20 = vpop.permute.xlu1 %221 }
  0x8e   : > { %v219_v22 = vsel %vm218_vm9, %v216_v19, 0.0  ;;  %v225_v26 = vsel %vm224_vm12, %v222_v20, 0.0 }
  0x8f   : > { %v394_v23 = vpack.c.bf16 %v219_v22, %v505_v2 }
  0x90   : > { %416 = vmatpush3.bf16.msk.msra.mxu0 %vm390_vm10, %v391_v21 }
  0x91   : > { %417 = vmatprep.subr.bf16.mxu0 %v458_v0  ;;  %v233_v24 = vpop.permute.xlu1 %232  ;;  %v228_v27 = vpop.permute.xlu0 %227 }
  0x92   : > { %v236_v25 = vsel %vm235_vm11, %v233_v24, 0.0  ;;  %v397_v30 = vpack.c.bf16 %v228_v27, %v225_v26 }
  0x93   : > { %v237_v28 = vsel %vm528_vm8, %v236_v25, 0.0 }
  0x94   : > { %418 = vmatpush3.bf16.msk.msra.mxu0 %vm393_vm14, %v394_v23  ;;  %v242_v29 = vpack.c.bf16 %v237_v28, %v237_v28 }
  0x95   : > { %419 = vmatprep.subr.bf16.mxu0 %v458_v0 }
  0x96   : > { %v268_v31 = vsel %vm266_vm1, %v242_v29, 0 }
  0x98   : > { %420 = vmatpush3.bf16.msk.msra.mxu0 %vm396_vm0, %v397_v30 }
  0x99   : > { %421 = vmatprep.subr.bf16.mxu0 %v458_v0 }
  0x9c   : > { %422 = vmatpush3.bf16.msra.mxu0 %v268_v31 }
  0x9f   : > { %424 = vmatmul.mubr.msk.bf16.vlgmr.msra.gmra.mrb[0].mxu0 %vm262_vm2, %v449_v32 }
  0xa2   : > { %v250_v33 = vpop.permute.xlu0 %249  ;;  %v255_v35 = vpop.permute.xlu1 %254 }
 0x172   : > { %v304_v34 = vpop.f32.mrb[0].mxu0 }
 0x173   : > { %v305_v36 = vadd.f32 %v304_v34, %v250_v33  ;;  %v425_v37 = vpop.f32.mrb[1].mxu0 }
 0x174   : > { %v307_v38 = vpop.f32.mrb[2].mxu0 }
 0x175   : > { %v405_v39 = vpack.c.bf16 %v305_v36, %v305_v36  ;;  %v308_v40 = vadd.f32 %v307_v38, %v255_v35  ;;  %v426_v41 = vpop.f32.mrb[3].mxu0 }
 0x177   : > { %320 = vst.msk [vmem:[%s167_s8] sm:$0xf] %vm319_vm3, %v405_v39  ;;  %v406_v42 = vpack.c.bf16 %v308_v40, %v308_v40 }
 0x179   : > { %321 = vst.msk [vmem:[%s167_s8 + $0x4] sm:$0xf] %vm319_vm3, %v406_v42 }
 0x17a PF: > { %s13_s12 = sadd.s32 1, %s456_s12  }
 0x17b   : > { %p10_p4 = scmp.ge.s32.totalorder %s13_s12, 4  }
 0x17d   :  { %12 = sbr.rel (!%p10_p4) target bundleno = 1 (0x1), region = 62 }

// kernel: up_v2_forward.3
= control target key start
LH: loop header
LB: loop body
LE: loop exit
PB: predicated region body
PF: predicated region fallthrough
CT: control target
= control target key end

     0   :  { %s2117_s17 = smov 0   ;;  %s3089_s0 = inlined_call_operand.vmem [shape: bf16[2,4,256], index: 0, kind: input, shape index: {}]   ;;  %s3090_s1 = inlined_call_operand.vmem [shape: bf16[2,4,256], index: 1, kind: input, shape index: {}]   ;;  %s3091_s2 = inlined_call_operand.vmem [shape: bf16[8,8], index: 2, kind: input, shape index: {}]   ;;  %s3092_s3 = inlined_call_operand.vmem [shape: f32[8,1], index: 3, kind: input, shape index: {}]   ;;  %s3093_s4 = inlined_call_operand.vmem [shape: f32[8,1], index: 4, kind: input, shape index: {}]   ;;  %s3094_s5 = inlined_call_operand.vmem [shape: f32[8,1], index: 5, kind: input, shape index: {}]   ;;  %s3095_s6 = inlined_call_operand.vmem [shape: bf16[48,8], index: 6, kind: input, shape index: {}]   ;;  %s3096_s7 = inlined_call_operand.vmem [shape: f32[48,9], index: 7, kind: input, shape index: {}]   ;;  %s3097_s8 = inlined_call_operand.vmem [shape: bf16[24,24], index: 8, kind: input, shape index: {}]   ;;  %s3098_s9 = inlined_call_operand.vmem [shape: f32[24,1], index: 9, kind: input, shape index: {}]   ;;  %s3099_s10 = inlined_call_operand.vmem [shape: bf16[8,24], index: 10, kind: input, shape index: {}]   ;;  %s3100_s11 = inlined_call_operand.vmem [shape: f32[2,8,256], index: 11, kind: output, shape index: {}]  }
   0x1 LB: > { %s1891_s18 = sadd.s32 4294967295, %s2035_s17   ;;  %p1895_p0 = scmp.ge.s32.totalorder %s2035_s17, 1  ;;  %s2035_s17 = sphi %s2117_s17, %s21_s17  }
   0x2   : > { %p347_p1 = scmp.lt.s32.totalorder %s2035_s17, 3 }
   0x4   : > { %p348_p2 = pnand %p1895_p0, %p347_p1 }
   0x6   : > { %351 = sbr.rel (%p348_p2) target bundleno = 1559 (0x617), region = 64 }
   0xd   : > { %p392_p3 = scmp.lt.s32.totalorder %s1891_s18, 1  ;;  %v3101_v0 = vmov 0   ;;  %v424_v1 = vld [vmem:[%s3092_s3] sm:$0xff]  ;;  %v2155_v9 = vld [vmem:[%s3096_s7 + $0x8] sm:$0xff]  ;;  %vm418_vm0 = vcmask 1043456   ;;  %vm430_vm1 = vcmask 64512  }
   0xe   : > { %472 = vmatprep.mubr.bf16.mxu0 %v3101_v0  ;;  %1977 = vset.pattern.permute.xlu0 %v3101_v0  ;;  %v520_v2 = vld [vmem:[%s3093_s4] sm:$0xff]  ;;  %v2038_v18 = vmov 1   ;;  %v2174_v19 = vld [vmem:[%s3096_s7 + $0x10] sm:$0xff]  ;;  %v2039_v20 = vmov 2   ;;  %v2040_v21 = vmov 3   ;;  %v2185_v22 = vld [vmem:[%s3096_s7 + $0x18] sm:$0xff] }
   0xf   : > { %s3194_s18 = smov (!%p392_p3, %s1891_s18), 1  ;;  %427 = vperm.xlu0 %1977, %v424_v1   ;;  %1978 = vset.pattern.permute.xlu1 %v3101_v0  ;;  %v528_v3 = vld [vmem:[%s3094_s5] sm:$0xff]  ;;  %v2191_v23 = vld [vmem:[%s3096_s7 + $0x28] sm:$0xff]  ;;  %v2041_v24 = vmov 4   ;;  %v2042_v25 = vmov 5   ;;  %v2043_v26 = vmov 6  }
  0x10   : > { %531 = vperm.xlu1 %1978, %v528_v3   ;;  %606 = vmatprep.mubr.bf16.mxu1 %v3101_v0  ;;  %s1918_s25 = sshll.u32 %s3194_s18, 2  ;;  %v2144_v4 = vld [vmem:[%s3096_s7] sm:$0xff]  ;;  %v2044_v27 = vmov 7   ;;  %v2045_v28 = vmov 8   ;;  %s2046_s16 = smov 16   ;;  %vm827_vm2 = vcmask 130048  }
  0x11   : > { %s396_s30 = scalar_lea.vmem %s3089_s0, %s1918_s25  ;;  %s401_s14 = scalar_lea.vmem %s3090_s1, %s1918_s25  ;;  %v423_v17 = vld [vmem:[%s3091_s2] sm:$0xf]  ;;  %vm706_vm3 = vcmask 138240   ;;  %vm924_vm5 = vcmask 121856   ;;  %vm1039_vm7 = vcmask 7168   ;;  %vm1196_vm10 = vcmask 1039360  }
  0x12   : > { %v408_v5 = vld [vmem:[%s396_s30] sm:$0xf]  ;;  %s2047_s19 = smov 17   ;;  %s2048_s20 = smov 15   ;;  %vm1414_vm11 = vcmask 916480   ;;  %vm1305_vm12 = vcmask 924672  }
  0x13   : > { %v410_v6 = vld [vmem:[%s401_s14] sm:$0xf]  ;;  %523 = vperm.xlu0 %1977, %v520_v2   ;;  %v409_v7 = vunpack.c.l.bf16 %v408_v5  ;;  %s2049_s21 = smov 112   ;;  %s2050_s22 = smov 1   ;;  %vm1511_vm13 = vcmask 908288   ;;  %vm2055_vm14 = vmmov 0  }
  0x14   : > { %v411_v8 = vunpack.c.l.bf16 %v410_v6  ;;  %751 = vperm.xlu1 %1978, %v2144_v4   ;;  %v2238_v39 = vld [vmem:[%s3096_s7 + $0x20] sm:$0xff]  ;;  %s2051_s23 = smov 111   ;;  %s2052_s24 = smov 127   ;;  %vm1654_vm15 = vcmask 195584  }
  0x15   : > { %v413_v10 = vcombine.high %v409_v7, %v409_v7  ;;  %s2053_s25 = smov 113  }
  0x16   : > { %v416_v11 = vcombine.low %v411_v8, %v411_v8 }
  0x17   : > { %756 = vperm.xlu0 %1977, %v2155_v9   ;;  %v420_v12 = vsel %vm418_vm0, %v413_v10, %v411_v8 }
  0x18   : > { %v419_v13 = vsel %vm418_vm0, %v409_v7, %v416_v11  ;;  %v422_v14 = vpack.c.bf16 %v420_v12, %v420_v12  ;;  %1979 = vset.pattern.permute.xlu1 %v2038_v18 }
  0x19   : > { %v421_v15 = vpack.c.bf16 %v419_v13, %v419_v13  ;;  %853 = vperm.xlu1 %1979, %v2144_v4  }
  0x1a   : > { %1902 = vmatprep.subr.msk.bf16.mxu0 %vm418_vm0, %v422_v14 }
  0x1b   : > { %v435_v16 = vsel %vm418_vm0, %v421_v15, 0  ;;  %1980 = vset.pattern.permute.xlu0 %v2038_v18 }
  0x1c   : > { %441 = vmatpush1.bf16.msra.mxu0 %v435_v16  ;;  %857 = vperm.xlu0 %1980, %v2155_v9  }
  0x1d   : > { %1981 = vset.pattern.permute.xlu1 %v2039_v20 }
  0x1e   : > { %968 = vperm.xlu1 %1981, %v2144_v4  }
  0x1f   : > { %1903 = vmatmul.mubr.msk.bf16.vlgmr.msra.gmra.mrb[0].mxu0 %vm430_vm1, %v423_v17 }
  0x20   : > { %861 = vperm.xlu0 %1980, %v2174_v19  }
  0x22   : > { %972 = vperm.xlu1 %1981, %v2155_v9  }
  0x24   : > { %865 = vperm.xlu0 %1980, %v2185_v22  }
  0x26   : > { %1982 = vset.pattern.permute.xlu1 %v2040_v21 }
  0x27   : > { %1081 = vperm.xlu1 %1982, %v2155_v9  }
  0x28   : > { %873 = vperm.xlu0 %1980, %v2191_v23  }
  0x2b   : > { %1983 = vset.pattern.permute.xlu1 %v3101_v0 }
  0x2c   : > { %761 = vperm.xlu1 %1983, %v2174_v19   ;;  %1996 = vset.pattern.permute.xlu0 %v2039_v20 }
  0x2d   : > { %976 = vperm.xlu0 %1996, %v2174_v19  }
  0x30   : > { %1984 = vset.pattern.permute.xlu1 %v2041_v24 }
  0x31   : > { %1125 = vperm.xlu1 %1984, %v2144_v4   ;;  %980 = vperm.xlu0 %1996, %v2185_v22  }
  0x35   : > { %1129 = vperm.xlu1 %1984, %v2155_v9   ;;  %988 = vperm.xlu0 %1996, %v2191_v23  }
  0x39   : > { %1985 = vset.pattern.permute.xlu1 %v2042_v25  ;;  %1998 = vset.pattern.permute.xlu0 %v2040_v21 }
  0x3a   : > { %1234 = vperm.xlu1 %1985, %v2144_v4   ;;  %1077 = vperm.xlu0 %1998, %v2144_v4  }
  0x3e   : > { %1238 = vperm.xlu1 %1985, %v2155_v9   ;;  %1085 = vperm.xlu0 %1998, %v2174_v19  }
  0x42   : > { %1986 = vset.pattern.permute.xlu1 %v2043_v26  ;;  %1089 = vperm.xlu0 %1998, %v2185_v22  }
  0x43   : > { %1343 = vperm.xlu1 %1986, %v2144_v4  }
  0x46   : > { %1097 = vperm.xlu0 %1998, %v2191_v23  }
  0x47   : > { %1347 = vperm.xlu1 %1986, %v2155_v9  }
  0x4a   : > { %2000 = vset.pattern.permute.xlu0 %v2041_v24 }
  0x4b   : > { %1987 = vset.pattern.permute.xlu1 %v2044_v27  ;;  %1133 = vperm.xlu0 %2000, %v2174_v19  }
  0x4c   : > { %1440 = vperm.xlu1 %1987, %v2144_v4  }
  0x4f   : > { %1145 = vperm.xlu0 %2000, %v2191_v23  }
  0x50   : > { %1444 = vperm.xlu1 %1987, %v2155_v9  }
  0x53   : > { %2002 = vset.pattern.permute.xlu0 %v2042_v25 }
  0x54   : > { %1988 = vset.pattern.permute.xlu1 %v2045_v28  ;;  %1242 = vperm.xlu0 %2002, %v2174_v19  }
  0x55   : > { %1549 = vperm.xlu1 %1988, %v2144_v4  }
  0x58   : > { %1254 = vperm.xlu0 %2002, %v2191_v23  }
  0x59   : > { %1553 = vperm.xlu1 %1988, %v2155_v9  }
  0x5c   : > { %2004 = vset.pattern.permute.xlu0 %v2043_v26 }
  0x5d   : > { %1989 = vset.pattern.permute.xlu1 %v3101_v0  ;;  %1351 = vperm.xlu0 %2004, %v2174_v19  }
  0x5e   : > { %766 = vperm.xlu1 %1989, %v2185_v22  }
  0x61   : > { %1363 = vperm.xlu0 %2004, %v2191_v23  }
  0x62   : > { %771 = vperm.xlu1 %1989, %v2238_v39  }
  0x65   : > { %2006 = vset.pattern.permute.xlu0 %v2044_v27 }
  0x66   : > { %1990 = vset.pattern.permute.xlu1 %v2038_v18  ;;  %1460 = vperm.xlu0 %2006, %v2191_v23  }
  0x67   : > { %869 = vperm.xlu1 %1990, %v2238_v39  }
  0x6a   : > { %2007 = vset.pattern.permute.xlu0 %v2045_v28 }
  0x6b   : > { %1991 = vset.pattern.permute.xlu1 %v2044_v27 }
  0x6c   : > { %1448 = vperm.xlu1 %1991, %v2174_v19  }
  0x70   : > { %1992 = vset.pattern.permute.xlu1 %v2039_v20 }
  0x71   : > { %984 = vperm.xlu1 %1992, %v2238_v39  }
  0x75   : > { %1993 = vset.pattern.permute.xlu1 %v2045_v28 }
  0x76   : > { %1557 = vperm.xlu1 %1993, %v2174_v19  }
  0x7a   : > { %1994 = vset.pattern.permute.xlu1 %v2040_v21  ;;  %v2010_v21 = vld [vmem:[%s3095_s6] sm:$0xff]  }
  0x7b   : > { %1093 = vperm.xlu1 %1994, %v2238_v39  }
  0x7f   : > { %1995 = vset.pattern.permute.xlu1 %v3101_v0 }
  0x80   : > { %776 = vperm.xlu1 %1995, %v2191_v23  }
  0x84   : > { %1997 = vset.pattern.permute.xlu1 %v2041_v24  ;;  %v2011_v24 = vld [vmem:[%s3095_s6 + $0x8] sm:$0xff]  }
  0x85   : > { %1137 = vperm.xlu1 %1997, %v2185_v22  }
  0x89   : > { %1141 = vperm.xlu1 %1997, %v2238_v39  }
  0x8d   : > { %1999 = vset.pattern.permute.xlu1 %v2042_v25  ;;  %v2012_v25 = vld [vmem:[%s3095_s6 + $0x10] sm:$0xff]  }
  0x8e   : > { %v428_v29 = vpop.permute.xlu0 %427  ;;  %1246 = vperm.xlu1 %1999, %v2185_v22  }
  0x8f   : > { %v532_v14 = vpop.permute.xlu1 %531 }
  0x92   : > { %v524_v11 = vpop.permute.xlu0 %523  ;;  %1250 = vperm.xlu1 %1999, %v2238_v39  }
  0x96   : > { %2001 = vset.pattern.permute.xlu1 %v2043_v26  ;;  %v2294_v26 = vpop.permute.xlu1 %751 }
  0x97   : > { %1355 = vperm.xlu1 %2001, %v2185_v22  }
  0x9b   : > { %1359 = vperm.xlu1 %2001, %v2238_v39  }
  0x9f   : > { %2003 = vset.pattern.permute.xlu1 %v2044_v27  ;;  %v2296_v27 = vpop.permute.xlu1 %853 }
  0xa0   : > { %1452 = vperm.xlu1 %2003, %v2185_v22  }
  0xa4   : > { %1456 = vperm.xlu1 %2003, %v2238_v39  }
  0xa8   : > { %2005 = vset.pattern.permute.xlu1 %v2045_v28 }
  0xa9   : > { %1561 = vperm.xlu1 %2005, %v2185_v22  }
  0xad   : > { %1565 = vperm.xlu1 %2005, %v2238_v39  }
  0xb1   : > { %2009 = vset.pattern.permute.xlu1 %v3101_v0 }
  0xf2   : > { %v474_v30 = vpop.f32.mrb[0].mxu0 }
  0xf3   : > { %v2225_v31 = vadd.f32 %v474_v30, %v428_v29  ;;  %v476_v32 = vpop.f32.mrb[1].mxu0 }
  0xf4   : > { %v2227_v33 = vadd.f32 %v476_v32, %v428_v29  ;;  %v478_v34 = vpop.f32.mrb[2].mxu0  ;;  %v2298_v29 = vpop.permute.xlu1 %968 }
  0xf5   : > { %3130 = vst [vmem:[#allocation2_spill] sm:$0xff] %v2225_v31  ;;  %v481_v35 = vrot.slane %v2225_v31, 4  ;;  %v479_v36 = vpop.f32.mrb[3].mxu0 }
  0xf6   : > { %3131 = vst [vmem:[#allocation3_spill] sm:$0xff] %v2227_v33  ;;  %v487_v37 = vrot.slane %v2227_v33, 4 }
  0xf7   : > { %v482_v38 = vadd.f32 %v481_v35, %v2225_v31 }
  0xf8   : > { %v488_v40 = vadd.f32 %v487_v37, %v2227_v33  ;;  %v2300_v30 = vpop.permute.xlu1 %972 }
  0xf9   : > { %v483_v41 = vrot.slane %v482_v38, 2 }
  0xfa   : > { %v489_v42 = vrot.slane %v488_v40, 2 }
  0xfb   : > { %v484_v43 = vadd.f32 %v483_v41, %v482_v38 }
  0xfc   : > { %v490_v44 = vadd.f32 %v489_v42, %v488_v40  ;;  %v2302_v32 = vpop.permute.xlu1 %1081 }
  0xfd   : > { %v485_v45 = vrot.slane %v484_v43, 1 }
  0xfe   : > { %v491_v46 = vrot.slane %v490_v44, 1 }
  0xff   : > { %v486_v47 = vadd.f32 %v485_v45, %v484_v43 }
 0x100   : > { %v492_v48 = vadd.f32 %v491_v46, %v490_v44  ;;  %v2304_v34 = vpop.permute.xlu1 %761  ;;  %v2336_v46 = vpop.permute.xlu0 %756 }
 0x101   : > { %v494_v49 = vmul.f32 0.125, %v486_v47 }
 0x102   : > { %v495_v50 = vmul.f32 0.125, %v492_v48 }
 0x103   : > { %v496_v51 = vsub.f32 %v2225_v31, %v494_v49 }
 0x104   : > { %v497_v52 = vsub.f32 %v2227_v33, %v495_v50  ;;  %v2306_v35 = vpop.permute.xlu1 %1125  ;;  %v2350_v49 = vpop.permute.xlu0 %857  ;;  %v643_v33 = vlaneseq }
 0x105   : > { %v498_v53 = vmul.f32 %v496_v51, %v496_v51 }
 0x106   : > { %v499_v54 = vmul.f32 %v497_v52, %v497_v52 }
 0x107   : > { %v500_v55 = vrot.slane %v498_v53, 4 }
 0x108   : > { %v506_v56 = vrot.slane %v499_v54, 4  ;;  %v2308_v28 = vpop.permute.xlu1 %1129 }
 0x109   : > { %v501_v57 = vadd.f32 %v500_v55, %v498_v53 }
 0x10a   : > { %v507_v58 = vadd.f32 %v506_v56, %v499_v54  ;;  %v2364_v54 = vpop.permute.xlu0 %861 }
 0x10b   : > { %v502_v59 = vrot.slane %v501_v57, 2 }
 0x10c   : > { %v508_v60 = vrot.slane %v507_v58, 2  ;;  %v2310_v22 = vpop.permute.xlu1 %1234 }
 0x10d   : > { %v503_v61 = vadd.f32 %v502_v59, %v501_v57 }
 0x10e   : > { %v509_v62 = vadd.f32 %v508_v60, %v507_v58  ;;  %v2384_v60 = vpop.permute.xlu0 %865 }
 0x10f   : > { %v504_v63 = vrot.slane %v503_v61, 1 }
 0x110   : > { %v510_v1 = vrot.slane %v509_v62, 1  ;;  %v2312_v36 = vpop.permute.xlu1 %1238 }
 0x111   : > { %v505_v2 = vadd.f32 %v504_v63, %v503_v61 }
 0x112   : > { %v511_v3 = vadd.f32 %v510_v1, %v509_v62  ;;  %v2392_v62 = vpop.permute.xlu0 %873 }
 0x113   : > { %v512_v4 = vmul.f32 0.125, %v505_v2  ;;  %3136 = vst [vmem:[#allocation8_spill] sm:$0xff] %v2392_v62 }
 0x114   : > { %v513_v5 = vmul.f32 0.125, %v511_v3  ;;  %v2314_v37 = vpop.permute.xlu1 %1343 }
 0x115   : > { %v514_v6 = vadd.f32 1e-05, %v512_v4 }
 0x116   : > { %v515_v7 = vadd.f32 1e-05, %v513_v5  ;;  %v2404_v1 = vpop.permute.xlu0 %976 }
 0x117   : > { %2013 = vrsqrt.f32 %v514_v6 }
 0x118   : > { %2015 = vrsqrt.f32 %v515_v7  ;;  %v2316_v38 = vpop.permute.xlu1 %1347 }
 0x11a   : > { %v2412_v3 = vpop.permute.xlu0 %980 }
 0x11c   : > { %v2318_v39 = vpop.permute.xlu1 %1440 }
 0x11e   : > { %v2420_v5 = vpop.permute.xlu0 %988 }
 0x11f   : > { %3138 = vst [vmem:[#allocation10_spill] sm:$0xff] %v2420_v5 }
 0x120   : > { %v2320_v40 = vpop.permute.xlu1 %1444 }
 0x121   : > { %v2014_v8 = vpop.eup %2013 }
 0x122   : > { %v2016_v9 = vpop.eup %2015  ;;  %v518_v10 = vmul.f32 %v2014_v8, %v496_v51  ;;  %v2432_v7 = vpop.permute.xlu0 %1077 }
 0x123   : > { %v519_v12 = vmul.f32 %v2016_v9, %v497_v52 }
 0x124   : > { %v526_v13 = vmul.f32 %v524_v11, %v518_v10  ;;  %v2330_v43 = vpop.permute.xlu1 %1549 }
 0x125   : > { %v527_v15 = vmul.f32 %v524_v11, %v519_v12 }
 0x126   : > { %v534_v16 = vadd.f32 %v532_v14, %v526_v13  ;;  %v2440_v9 = vpop.permute.xlu0 %1085 }
 0x127   : > { %v535_v17 = vadd.f32 %v532_v14, %v527_v15 }
 0x128   : > { %v542_v18 = vpack.c.bf16 %v534_v16, %v534_v16  ;;  %v2342_v47 = vpop.permute.xlu1 %1553 }
 0x129   : > { %v543_v19 = vpack.c.bf16 %v535_v17, %v535_v17 }
 0x12a   : > { %v569_v20 = vsel %vm418_vm0, %v542_v18, 0  ;;  %v2452_v11 = vpop.permute.xlu0 %1089 }
 0x12b   : > { %1907 = vmatprep.subr.msk.bf16.mxu1 %vm418_vm0, %v543_v19  ;;  %3142 = vst [vmem:[#allocation14_spill] sm:$0xff] %v2452_v11 }
 0x12c   : > { %575 = vmatpush1.bf16.msra.mxu1 %v569_v20  ;;  %v2362_v53 = vpop.permute.xlu1 %766 }
 0x12e   : > { %v2460_v13 = vpop.permute.xlu0 %1097 }
 0x12f   : > { %1908 = vmatmul.mubr.msk.bf16.vlgmr.msra.gmra.mrb[0].mxu1 %vm430_vm1, %v2010_v21  ;;  %3144 = vst [vmem:[#allocation16_spill] sm:$0xff] %v2460_v13 }
 0x130   : > { %616 = vmatprep.mubr.bf16.mxu1 %v3101_v0  ;;  %v2376_v58 = vpop.permute.xlu1 %771 }
 0x131   : > { %3134 = vst [vmem:[#allocation6_spill] sm:$0xff] %v2376_v58 }
 0x132   : > { %v2472_v15 = vpop.permute.xlu0 %1133 }
 0x134   : > { %v2386_v61 = vpop.permute.xlu1 %869 }
 0x135   : > { %3135 = vst [vmem:[#allocation7_spill] sm:$0xff] %v2386_v61 }
 0x136   : > { %v2480_v17 = vpop.permute.xlu0 %1145 }
 0x137   : > { %1909 = vmatmul.mubr.msk.bf16.gmra.mrb[4].mxu1 %vm430_vm1, %v2011_v24  ;;  %3147 = vst [vmem:[#allocation19_spill] sm:$0xff] %v2480_v17  ;;  %v644_v17 = vand.u32 127, %v643_v33 }
 0x138   : > { %626 = vmatprep.mubr.bf16.mxu1 %v3101_v0  ;;  %v2398_v63 = vpop.permute.xlu1 %1448 }
 0x139   : > { %v650_v5 = vand.u32 15, %v644_v17 }
 0x13a   : > { %v2492_v19 = vpop.permute.xlu0 %1242 }
 0x13b   : > { %vm2540_vm4 = vcmp.ge.s32.totalorder %v650_v5, 1  ;;  %vm2554_vm6 = vcmp.lt.s32.totalorder %v650_v5, 15 }
 0x13c   : > { %v2406_v2 = vpop.permute.xlu1 %984 }
 0x13d   : > { %3137 = vst [vmem:[#allocation9_spill] sm:$0xff] %v2406_v2 }
 0x13e   : > { %v2500_v21 = vpop.permute.xlu0 %1254 }
 0x13f   : > { %1910 = vmatmul.mubr.msk.bf16.gmra.mrb[8].mxu1 %vm430_vm1, %v2012_v25  ;;  %3150 = vst [vmem:[#allocation22_spill] sm:$0xff] %v2500_v21 }
 0x140   : > { %v2418_v4 = vpop.permute.xlu1 %1557 }
 0x142   : > { %v2512_v25 = vpop.permute.xlu0 %1351 }
 0x144   : > { %v2426_v6 = vpop.permute.xlu1 %1093 }
 0x145   : > { %3139 = vst [vmem:[#allocation11_spill] sm:$0xff] %v2426_v6 }
 0x146   : > { %v2520_v31 = vpop.permute.xlu0 %1363 }
 0x147   : > { %3153 = vst [vmem:[#allocation25_spill] sm:$0xff] %v2520_v31 }
 0x148   : > { %v2438_v8 = vpop.permute.xlu1 %776 }
 0x149   : > { %3140 = vst [vmem:[#allocation12_spill] sm:$0xff] %v2438_v8 }
 0x14a   : > { %v2532_v13 = vpop.permute.xlu0 %1460 }
 0x14b   : > { %3155 = vst [vmem:[#allocation27_spill] sm:$0xff] %v2532_v13 }
 0x14c   : > { %v2446_v10 = vpop.permute.xlu1 %1137 }
 0x14d   : > { %3141 = vst [vmem:[#allocation13_spill] sm:$0xff] %v2446_v10 }
 0x150   : > { %v2454_v12 = vpop.permute.xlu1 %1141 }
 0x151   : > { %3143 = vst [vmem:[#allocation15_spill] sm:$0xff] %v2454_v12 }
 0x154   : > { %v2466_v14 = vpop.permute.xlu1 %1246 }
 0x155   : > { %3145 = vst [vmem:[#allocation17_spill] sm:$0xff] %v2466_v14 }
 0x158   : > { %v2474_v16 = vpop.permute.xlu1 %1250 }
 0x159   : > { %3146 = vst [vmem:[#allocation18_spill] sm:$0xff] %v2474_v16 }
 0x15c   : > { %v2486_v18 = vpop.permute.xlu1 %1355 }
 0x15d   : > { %3148 = vst [vmem:[#allocation20_spill] sm:$0xff] %v2486_v18 }
 0x160   : > { %v2494_v20 = vpop.permute.xlu1 %1359 }
 0x161   : > { %3149 = vst [vmem:[#allocation21_spill] sm:$0xff] %v2494_v20 }
 0x164   : > { %v2506_v24 = vpop.permute.xlu1 %1452 }
 0x165   : > { %3151 = vst [vmem:[#allocation23_spill] sm:$0xff] %v2506_v24 }
 0x168   : > { %v2514_v0 = vpop.permute.xlu1 %1456 }
 0x169   : > { %3152 = vst [vmem:[#allocation24_spill] sm:$0xff] %v2514_v0 }
 0x16c   : > { %v2522_v21 = vpop.permute.xlu1 %1561 }
 0x16d   : > { %3154 = vst [vmem:[#allocation26_spill] sm:$0xff] %v2522_v21 }
 0x170   : > { %v2534_v8 = vpop.permute.xlu1 %1565 }
 0x171   : > { %3156 = vst [vmem:[#allocation28_spill] sm:$0xff] %v2534_v8 }
 0x202   : > { %v2322_v41 = vpop.f32.mrb[0].mxu1 }
 0x203   : > { %803 = vrot.lane.b32.xlu0 %v2322_v41, %s2046_s16  ;;  %682 = vrot.lane.b32.xlu1 %v2322_v41, %s2047_s19  ;;  %v2328_v42 = vpop.f32.mrb[1].mxu1 }
 0x204   : > { %v2332_v44 = vpop.f32.mrb[2].mxu1 }
 0x205   : > { %v2334_v45 = vpop.f32.mrb[3].mxu1 }
 0x207   : > { %900 = vrot.lane.b32.xlu0 %v2322_v41, %s2048_s20  ;;  %1390 = vrot.lane.b32.xlu1 %v2322_v41, %s2049_s21 }
 0x20a   : > { %v2344_v48 = vpop.f32.mrb[4].mxu1 }
 0x20b   : > { %1015 = vrot.lane.b32.xlu0 %v2322_v41, %s2050_s22  ;;  %1487 = vrot.lane.b32.xlu1 %v2322_v41, %s2051_s23  ;;  %v2352_v50 = vpop.f32.mrb[5].mxu1 }
 0x20c   : > { %v2354_v51 = vpop.f32.mrb[6].mxu1 }
 0x20d   : > { %3132 = vst [vmem:[#allocation4_spill] sm:$0xff] %v2354_v51  ;;  %v2356_v52 = vpop.f32.mrb[7].mxu1 }
 0x20e   : > { %3133 = vst [vmem:[#allocation5_spill] sm:$0xff] %v2356_v52 }
 0x20f   : > { %1172 = vrot.lane.b32.xlu0 %v2322_v41, %s2052_s24  ;;  %805 = vrot.lane.b32.xlu1 %v2328_v42, %s2046_s16 }
 0x212   : > { %v2366_v55 = vpop.f32.mrb[8].mxu1 }
 0x213   : > { %1281 = vrot.lane.b32.xlu0 %v2322_v41, %s2053_s25  ;;  %902 = vrot.lane.b32.xlu1 %v2328_v42, %s2048_s20  ;;  %v2372_v56 = vpop.f32.mrb[9].mxu1 }
 0x214   : > { %v2374_v57 = vpop.f32.mrb[10].mxu1 }
 0x215   : > { %v2378_v59 = vpop.f32.mrb[11].mxu1 }
 0x217   : > { %1017 = vrot.lane.b32.xlu1 %v2328_v42, %s2050_s22  ;;  %684 = vrot.lane.b32.xlu0 %v2328_v42, %s2047_s19 }
 0x21b   : > { %1174 = vrot.lane.b32.xlu1 %v2328_v42, %s2052_s24  ;;  %1392 = vrot.lane.b32.xlu0 %v2328_v42, %s2049_s21 }
 0x21f   : > { %1283 = vrot.lane.b32.xlu1 %v2328_v42, %s2053_s25  ;;  %1489 = vrot.lane.b32.xlu0 %v2328_v42, %s2051_s23 }
 0x223   : > { %807 = vrot.lane.b32.xlu0 %v2332_v44, %s2046_s16  ;;  %686 = vrot.lane.b32.xlu1 %v2332_v44, %s2047_s19 }
 0x227   : > { %904 = vrot.lane.b32.xlu0 %v2332_v44, %s2048_s20  ;;  %1394 = vrot.lane.b32.xlu1 %v2332_v44, %s2049_s21 }
 0x22b   : > { %1019 = vrot.lane.b32.xlu0 %v2332_v44, %s2050_s22  ;;  %1491 = vrot.lane.b32.xlu1 %v2332_v44, %s2051_s23 }
 0x22f   : > { %1176 = vrot.lane.b32.xlu0 %v2332_v44, %s2052_s24  ;;  %809 = vrot.lane.b32.xlu1 %v2334_v45, %s2046_s16 }
 0x233   : > { %1285 = vrot.lane.b32.xlu0 %v2332_v44, %s2053_s25  ;;  %906 = vrot.lane.b32.xlu1 %v2334_v45, %s2048_s20 }
 0x237   : > { %1021 = vrot.lane.b32.xlu1 %v2334_v45, %s2050_s22  ;;  %688 = vrot.lane.b32.xlu0 %v2334_v45, %s2047_s19 }
 0x23b   : > { %1178 = vrot.lane.b32.xlu1 %v2334_v45, %s2052_s24  ;;  %1396 = vrot.lane.b32.xlu0 %v2334_v45, %s2049_s21 }
 0x23f   : > { %1287 = vrot.lane.b32.xlu1 %v2334_v45, %s2053_s25  ;;  %1493 = vrot.lane.b32.xlu0 %v2334_v45, %s2051_s23 }
 0x243   : > { %1180 = vrot.lane.b32.xlu1 %v2344_v48, %s2052_s24  ;;  %690 = vrot.lane.b32.xlu0 %v2344_v48, %s2047_s19 }
 0x247   : > { %1289 = vrot.lane.b32.xlu1 %v2344_v48, %s2053_s25  ;;  %811 = vrot.lane.b32.xlu0 %v2344_v48, %s2046_s16 }
 0x24b   : > { %908 = vrot.lane.b32.xlu0 %v2344_v48, %s2048_s20  ;;  %692 = vrot.lane.b32.xlu1 %v2352_v50, %s2047_s19 }
 0x24f   : > { %1023 = vrot.lane.b32.xlu0 %v2344_v48, %s2050_s22  ;;  %813 = vrot.lane.b32.xlu1 %v2352_v50, %s2046_s16 }
 0x253   : > { %1398 = vrot.lane.b32.xlu0 %v2344_v48, %s2049_s21  ;;  %910 = vrot.lane.b32.xlu1 %v2352_v50, %s2048_s20 }
 0x257   : > { %1495 = vrot.lane.b32.xlu0 %v2344_v48, %s2051_s23  ;;  %1025 = vrot.lane.b32.xlu1 %v2352_v50, %s2050_s22 }
 0x25b   : > { %1182 = vrot.lane.b32.xlu0 %v2352_v50, %s2052_s24  ;;  %1400 = vrot.lane.b32.xlu1 %v2352_v50, %s2049_s21 }
 0x25f   : > { %1291 = vrot.lane.b32.xlu0 %v2352_v50, %s2053_s25  ;;  %1497 = vrot.lane.b32.xlu1 %v2352_v50, %s2051_s23 }
 0x263   : > { %815 = vrot.lane.b32.xlu0 %v2354_v51, %s2046_s16  ;;  %694 = vrot.lane.b32.xlu1 %v2354_v51, %s2047_s19 }
 0x267   : > { %912 = vrot.lane.b32.xlu0 %v2354_v51, %s2048_s20  ;;  %1402 = vrot.lane.b32.xlu1 %v2354_v51, %s2049_s21 }
 0x26b   : > { %1027 = vrot.lane.b32.xlu0 %v2354_v51, %s2050_s22  ;;  %817 = vrot.lane.b32.xlu1 %v2356_v52, %s2046_s16 }
 0x26f   : > { %1184 = vrot.lane.b32.xlu0 %v2354_v51, %s2052_s24  ;;  %914 = vrot.lane.b32.xlu1 %v2356_v52, %s2048_s20 }
 0x273   : > { %1293 = vrot.lane.b32.xlu0 %v2354_v51, %s2053_s25  ;;  %1029 = vrot.lane.b32.xlu1 %v2356_v52, %s2050_s22 }
 0x275   : > { %v804_v31 = vpop.permute.xlu0 %803  ;;  %v683_v62 = vpop.permute.xlu1 %682 }
 0x276   : > { %v846_v0 = vsel %vm827_vm2, 0.0, %v804_v31  ;;  %v725_v13 = vsel %vm706_vm3, 0.0, %v683_v62 }
 0x277   : > { %v737_v8 = vsel %vm2540_vm4, %v725_v13, 0.0  ;;  %1499 = vrot.lane.b32.xlu0 %v2354_v51, %s2051_s23  ;;  %1186 = vrot.lane.b32.xlu1 %v2356_v52, %s2052_s24  ;;  %v876_v20 = vmul.f32 %v2296_v27, %v846_v0 }
 0x278   : > { %v779_v16 = vmul.f32 %v2294_v26, %v737_v8 }
 0x279   : > { %v901_v6 = vpop.permute.xlu0 %900  ;;  %v2558_v2 = vpop.permute.xlu1 %1390 }
 0x27a   : > { %v943_v13 = vsel %vm924_vm5, 0.0, %v901_v6  ;;  %v888_v0 = vadd.f32 %v876_v20, %v779_v16  ;;  %v645_v16 = vadd.s32 128, %v644_v17 }
 0x27b   : > { %v955_v61 = vsel %vm2554_vm6, %v943_v13, 0.0  ;;  %1295 = vrot.lane.b32.xlu1 %v2356_v52, %s2053_s25  ;;  %696 = vrot.lane.b32.xlu0 %v2356_v52, %s2047_s19 }
 0x27c   : > { %v991_v5 = vmul.f32 %v2298_v29, %v955_v61 }
 0x27d   : > { %v1016_v8 = vpop.permute.xlu0 %1015  ;;  %v2568_v58 = vpop.permute.xlu1 %1487 }
 0x27e   : > { %v1003_v21 = vadd.f32 %v991_v5, %v888_v0  ;;  %v1058_v24 = vsel %vm1039_vm7, 0.0, %v1016_v8  ;;  %v1148_v0 = vmul.f32 %v2306_v35, %v2322_v41 }
 0x27f   : > { %v1064_v18 = vsel %vm2540_vm4, %v1058_v24, 0.0  ;;  %1404 = vrot.lane.b32.xlu1 %v2356_v52, %s2049_s21  ;;  %819 = vrot.lane.b32.xlu0 %v2366_v55, %s2046_s16  ;;  %v657_v24 = vand.u32 15, %v645_v16 }
 0x280   : > { %v1100_v13 = vmul.f32 %v2432_v7, %v1064_v18  ;;  %v3190_v18 = vld [vmem:[#allocation27_spill] sm:$0xff] }
 0x281   : > { %v1173_v20 = vpop.permute.xlu0 %1172  ;;  %v806_v61 = vpop.permute.xlu1 %805  ;;  %vm2588_vm8 = vcmp.lt.s32.totalorder %v657_v24, 15  ;;  %vm2593_vm9 = vcmp.ge.s32.totalorder %v657_v24, 1 }
 0x282   : > { %v1112_v14 = vadd.f32 %v1100_v13, %v1003_v21 }
 0x283   : > { %1501 = vrot.lane.b32.xlu1 %v2356_v52, %s2051_s23  ;;  %916 = vrot.lane.b32.xlu0 %v2366_v55, %s2048_s20 }
 0x284   : > { %v1160_v5 = vadd.f32 %v1148_v0, %v1112_v14  ;;  %v828_v14 = vsel %vm827_vm2, %v804_v31, %v806_v61 }
 0x285   : > { %v1282_v10 = vpop.permute.xlu0 %1281  ;;  %v903_v51 = vpop.permute.xlu1 %902  ;;  %v877_v31 = vmul.f32 %v2296_v27, %v828_v14 }
 0x286   : > { %v925_v41 = vsel %vm924_vm5, %v901_v6, %v903_v51 }
 0x287   : > { %1031 = vrot.lane.b32.xlu0 %v2366_v55, %s2050_s22  ;;  %698 = vrot.lane.b32.xlu1 %v2366_v55, %s2047_s19  ;;  %v956_v52 = vsel %vm2588_vm8, %v925_v41, 0.0 }
 0x288   : > { %v992_v61 = vmul.f32 %v2298_v29, %v956_v52  ;;  %v1149_v52 = vmul.f32 %v2306_v35, %v2328_v42 }
 0x289   : > { %v1018_v21 = vpop.permute.xlu1 %1017  ;;  %v685_v13 = vpop.permute.xlu0 %684 }
 0x28a   : > { %v1040_v16 = vsel %vm1039_vm7, %v1016_v8, %v1018_v21  ;;  %v707_v0 = vsel %vm706_vm3, %v683_v62, %v685_v13 }
 0x28b   : > { %v738_v11 = vsel %vm2593_vm9, %v707_v0, 0.0  ;;  %1188 = vrot.lane.b32.xlu0 %v2366_v55, %s2052_s24  ;;  %821 = vrot.lane.b32.xlu1 %v2372_v56, %s2046_s16  ;;  %v1065_v62 = vsel %vm2593_vm9, %v1040_v16, 0.0 }
 0x28c   : > { %v780_v51 = vmul.f32 %v2294_v26, %v738_v11  ;;  %v1101_v26 = vmul.f32 %v2432_v7, %v1065_v62 }
 0x28d   : > { %v1175_v6 = vpop.permute.xlu1 %1174  ;;  %v1393_v8 = vpop.permute.xlu0 %1392 }
 0x28e   : > { %v889_v24 = vadd.f32 %v877_v31, %v780_v51  ;;  %v1197_v41 = vsel %vm1196_vm10, %v1173_v20, %v1175_v6  ;;  %v1215_v21 = vsel %vm1196_vm10, %v1175_v6, 0.0  ;;  %v1415_v20 = vsel %vm1414_vm11, %v2558_v2, %v1393_v8 }
 0x28f   : > { %v1221_v13 = vsel %vm2554_vm6, %v1197_v41, 0.0  ;;  %1297 = vrot.lane.b32.xlu0 %v2366_v55, %s2053_s25  ;;  %918 = vrot.lane.b32.xlu1 %v2372_v56, %s2048_s20  ;;  %v1222_v11 = vsel %vm2588_vm8, %v1215_v21, 0.0  ;;  %v1433_v62 = vsel %vm1414_vm11, %v1393_v8, 0.0 }
 0x290   : > { %v1004_v27 = vadd.f32 %v992_v61, %v889_v24  ;;  %v1257_v29 = vmul.f32 %v2310_v22, %v1221_v13  ;;  %v1463_v61 = vmul.f32 %v2318_v39, %v1415_v20 }
 0x291   : > { %v1284_v14 = vpop.permute.xlu1 %1283  ;;  %v1490_v16 = vpop.permute.xlu0 %1489 }
 0x292   : > { %v1113_v0 = vadd.f32 %v1101_v26, %v1004_v27  ;;  %v1269_v31 = vadd.f32 %v1257_v29, %v1160_v5  ;;  %v1306_v51 = vsel %vm1305_vm12, %v1282_v10, %v1284_v14  ;;  %v1324_v7 = vsel %vm1305_vm12, %v1284_v14, 0.0 }
 0x293   : > { %v1330_v6 = vsel %vm2540_vm4, %v1306_v51, 0.0  ;;  %v1331_v35 = vsel %vm2593_vm9, %v1324_v7, 0.0  ;;  %v1512_v42 = vsel %vm1511_vm13, %v2568_v58, %v1490_v16  ;;  %1406 = vrot.lane.b32.xlu0 %v2366_v55, %s2049_s21  ;;  %1033 = vrot.lane.b32.xlu1 %v2372_v56, %s2050_s22  ;;  %v1258_v10 = vmul.f32 %v2310_v22, %v1222_v11 }
 0x294   : > { %v1161_v2 = vadd.f32 %v1149_v52, %v1113_v0  ;;  %v1366_v5 = vmul.f32 %v2314_v37, %v1330_v6  ;;  %v1530_v8 = vsel %vm1511_vm13, %v1490_v16, 0.0  ;;  %v1536_v24 = vsel %vm2554_vm6, %v1512_v42, 0.0 }
 0x295   : > { %v808_v41 = vpop.permute.xlu0 %807  ;;  %v687_v58 = vpop.permute.xlu1 %686  ;;  %v1367_v13 = vmul.f32 %v2314_v37, %v1331_v35  ;;  %v1464_v29 = vmul.f32 %v2318_v39, %v1433_v62  ;;  %v1537_v22 = vsel %vm2588_vm8, %v1530_v8, 0.0  ;;  %v1572_v14 = vmul.f32 %v2330_v43, %v1536_v24 }
 0x296   : > { %v1270_v21 = vadd.f32 %v1258_v10, %v1161_v2  ;;  %v1378_v26 = vadd.f32 %v1366_v5, %v1269_v31  ;;  %v847_v27 = vsel %vm827_vm2, 0.0, %v808_v41  ;;  %v726_v11 = vsel %vm706_vm3, 0.0, %v687_v58 }
 0x297   : > { %v878_v52 = vmul.f32 %v2350_v49, %v847_v27  ;;  %1503 = vrot.lane.b32.xlu0 %v2366_v55, %s2051_s23  ;;  %1190 = vrot.lane.b32.xlu1 %v2372_v56, %s2052_s24  ;;  %v739_v39 = vsel %vm2540_vm4, %v726_v11, 0.0  ;;  %v1573_v7 = vmul.f32 %v2330_v43, %v1537_v22  ;;  %v1150_v22 = vmul.f32 %v2308_v28, %v2332_v44 }
 0x298   : > { %v1379_v20 = vadd.f32 %v1367_v13, %v1270_v21  ;;  %v1475_v37 = vadd.f32 %v1463_v61, %v1378_v26  ;;  %v781_v16 = vmul.f32 %v2336_v46, %v739_v39 }
 0x299   : > { %v905_v0 = vpop.permute.xlu0 %904  ;;  %v1395_v31 = vpop.permute.xlu1 %1394 }
 0x29a   : > { %v1476_v51 = vadd.f32 %v1464_v29, %v1379_v20  ;;  %v2664_v62 = vadd.f32 %v1572_v14, %v1475_v37  ;;  %v944_v6 = vsel %vm924_vm5, 0.0, %v905_v0  ;;  %v890_v35 = vadd.f32 %v878_v52, %v781_v16 }
 0x29b   : > { %v957_v42 = vsel %vm2554_vm6, %v944_v6, 0.0  ;;  %1299 = vrot.lane.b32.xlu1 %v2372_v56, %s2053_s25  ;;  %700 = vrot.lane.b32.xlu0 %v2372_v56, %s2047_s19 }
 0x29c   : > { %v2673_v2 = vadd.f32 %v1573_v7, %v1476_v51  ;;  %v993_v10 = vmul.f32 %v2300_v30, %v957_v42 }
 0x29d   : > { %v1020_v5 = vpop.permute.xlu0 %1019  ;;  %v1492_v43 = vpop.permute.xlu1 %1491 }
 0x29e   : > { %v1005_v8 = vadd.f32 %v993_v10, %v890_v35  ;;  %v1059_v61 = vsel %vm1039_vm7, 0.0, %v1020_v5 }
 0x29f   : > { %1408 = vrot.lane.b32.xlu1 %v2372_v56, %s2049_s21  ;;  %702 = vrot.lane.b32.xlu0 %v2374_v57, %s2047_s19  ;;  %v1066_v24 = vsel %vm2540_vm4, %v1059_v61, 0.0 }
 0x2a0   : > { %v1102_v21 = vmul.f32 %v2302_v32, %v1066_v24 }
 0x2a1   : > { %v1177_v13 = vpop.permute.xlu0 %1176  ;;  %v810_v26 = vpop.permute.xlu1 %809 }
 0x2a2   : > { %v829_v27 = vsel %vm827_vm2, %v808_v41, %v810_v26  ;;  %v1114_v29 = vadd.f32 %v1102_v21, %v1005_v8  ;;  %v1151_v21 = vmul.f32 %v2308_v28, %v2334_v45 }
 0x2a3   : > { %1505 = vrot.lane.b32.xlu1 %v2372_v56, %s2051_s23  ;;  %823 = vrot.lane.b32.xlu0 %v2374_v57, %s2046_s16 }
 0x2a4   : > { %v1162_v20 = vadd.f32 %v1150_v22, %v1114_v29 }
 0x2a5   : > { %v1286_v52 = vpop.permute.xlu0 %1285  ;;  %v907_v11 = vpop.permute.xlu1 %906 }
 0x2a6   : > { %v926_v37 = vsel %vm924_vm5, %v905_v0, %v907_v11  ;;  %v879_v0 = vmul.f32 %v2350_v49, %v829_v27 }
 0x2a7   : > { %1192 = vrot.lane.b32.xlu1 %v2374_v57, %s2052_s24  ;;  %920 = vrot.lane.b32.xlu0 %v2374_v57, %s2048_s20  ;;  %v958_v39 = vsel %vm2588_vm8, %v926_v37, 0.0 }
 0x2a8   : > { %v994_v6 = vmul.f32 %v2300_v30, %v958_v39 }
 0x2a9   : > { %v1022_v41 = vpop.permute.xlu1 %1021  ;;  %v689_v14 = vpop.permute.xlu0 %688 }
 0x2aa   : > { %v1041_v16 = vsel %vm1039_vm7, %v1020_v5, %v1022_v41  ;;  %v708_v44 = vsel %vm706_vm3, %v687_v58, %v689_v14  ;;  %v3165_v14 = vmov 0  }
 0x2ab   : > { %v740_v51 = vsel %vm2593_vm9, %v708_v44, 0.0  ;;  %1301 = vrot.lane.b32.xlu1 %v2374_v57, %s2053_s25  ;;  %1035 = vrot.lane.b32.xlu0 %v2374_v57, %s2050_s22  ;;  %v1067_v35 = vsel %vm2593_vm9, %v1041_v16, 0.0 }
 0x2ac   : > { %v782_v7 = vmul.f32 %v2336_v46, %v740_v51  ;;  %v1103_v30 = vmul.f32 %v2302_v32, %v1067_v35 }
 0x2ad   : > { %v1179_v42 = vpop.permute.xlu1 %1178  ;;  %v1397_v58 = vpop.permute.xlu0 %1396 }
 0x2ae   : > { %v891_v10 = vadd.f32 %v879_v0, %v782_v7  ;;  %v1198_v5 = vsel %vm1196_vm10, %v1177_v13, %v1179_v42  ;;  %v1216_v8 = vsel %vm1196_vm10, %v1179_v42, 0.0  ;;  %v1416_v61 = vsel %vm1414_vm11, %v1395_v31, %v1397_v58 }
 0x2af   : > { %v1223_v24 = vsel %vm2554_vm6, %v1198_v5, 0.0  ;;  %1569 = vperm.xlu0 %2007, %v2191_v23   ;;  %704 = vrot.lane.b32.xlu1 %v2378_v59, %s2047_s19  ;;  %v1224_v13 = vsel %vm2588_vm8, %v1216_v8, 0.0  ;;  %v1434_v11 = vsel %vm1414_vm11, %v1397_v58, 0.0  ;;  %v1465_v39 = vmul.f32 %v2320_v40, %v1416_v61 }
 0x2b0   : > { %v1006_v46 = vadd.f32 %v994_v6, %v891_v10  ;;  %v1259_v49 = vmul.f32 %v2312_v36, %v1223_v24  ;;  %v1466_v6 = vmul.f32 %v2320_v40, %v1434_v11 }
 0x2b1   : > { %v1288_v31 = vpop.permute.xlu1 %1287  ;;  %v1494_v26 = vpop.permute.xlu0 %1493 }
 0x2b2   : > { %v1115_v27 = vadd.f32 %v1103_v30, %v1006_v46  ;;  %v1271_v29 = vadd.f32 %v1259_v49, %v1162_v20  ;;  %v1307_v23 = vsel %vm1305_vm12, %v1286_v52, %v1288_v31  ;;  %v1325_v22 = vsel %vm1305_vm12, %v1288_v31, 0.0 }
 0x2b3   : > { %v1332_v32 = vsel %vm2540_vm4, %v1307_v23, 0.0  ;;  %v1333_v37 = vsel %vm2593_vm9, %v1325_v22, 0.0  ;;  %v1513_v28 = vsel %vm1511_vm13, %v1492_v43, %v1494_v26  ;;  %1410 = vrot.lane.b32.xlu0 %v2374_v57, %s2049_s21  ;;  %825 = vrot.lane.b32.xlu1 %v2378_v59, %s2046_s16  ;;  %v1260_v52 = vmul.f32 %v2312_v36, %v1224_v13 }
 0x2b4   : > { %v1163_v45 = vadd.f32 %v1151_v21, %v1115_v27  ;;  %v1368_v20 = vmul.f32 %v2316_v38, %v1332_v32  ;;  %v1531_v41 = vsel %vm1511_vm13, %v1494_v26, 0.0  ;;  %2008 = vset.pattern.permute.xlu0 %v3165_v14  ;;  %v1538_v43 = vsel %vm2554_vm6, %v1513_v28, 0.0 }
 0x2b5   : > { %v2744_v16 = vpop.permute.xlu1 %1180  ;;  %v691_v44 = vpop.permute.xlu0 %690  ;;  %v1369_v0 = vmul.f32 %v2316_v38, %v1333_v37  ;;  %v1539_v35 = vsel %vm2588_vm8, %v1531_v41, 0.0  ;;  %v1574_v10 = vmul.f32 %v2342_v47, %v1538_v43 }
 0x2b6   : > { %v1272_v51 = vadd.f32 %v1260_v52, %v1163_v45  ;;  %v1380_v7 = vadd.f32 %v1368_v20, %v1271_v29  ;;  %v727_v36 = vsel %vm706_vm3, 0.0, %v691_v44  ;;  %v1575_v61 = vmul.f32 %v2342_v47, %v1539_v35 }
 0x2b7   : > { %1507 = vrot.lane.b32.xlu0 %v2374_v57, %s2051_s23  ;;  %922 = vrot.lane.b32.xlu1 %v2378_v59, %s2048_s20  ;;  %v741_v38 = vsel %vm2540_vm4, %v727_v36, 0.0 }
 0x2b8   : > { %v1381_v42 = vadd.f32 %v1369_v0, %v1272_v51  ;;  %v1477_v58 = vadd.f32 %v1465_v39, %v1380_v7  ;;  %v783_v46 = vmul.f32 %v2304_v34, %v741_v38  ;;  %v1152_v0 = vmul.f32 %v2472_v15, %v2344_v48 }
 0x2b9   : > { %v2758_v5 = vpop.permute.xlu1 %1289  ;;  %v812_v8 = vpop.permute.xlu0 %811 }
 0x2ba   : > { %v1478_v40 = vadd.f32 %v1466_v6, %v1381_v42  ;;  %v2761_v24 = vadd.f32 %v1574_v10, %v1477_v58  ;;  %v848_v30 = vsel %vm827_vm2, 0.0, %v812_v8 }
 0x2bb   : > { %v880_v49 = vmul.f32 %v2364_v54, %v848_v30  ;;  %1037 = vrot.lane.b32.xlu1 %v2378_v59, %s2050_s22 }
 0x2bc   : > { %v2768_v21 = vadd.f32 %v1575_v61, %v1478_v40 }
 0x2bd   : > { %v892_v13 = vadd.f32 %v880_v49, %v783_v46  ;;  %v909_v31 = vpop.permute.xlu0 %908  ;;  %v693_v26 = vpop.permute.xlu1 %692 }
 0x2be   : > { %v945_v27 = vsel %vm924_vm5, 0.0, %v909_v31  ;;  %v709_v29 = vsel %vm706_vm3, %v691_v44, %v693_v26 }
 0x2bf   : > { %v959_v47 = vsel %vm2554_vm6, %v945_v27, 0.0  ;;  %1194 = vrot.lane.b32.xlu1 %v2378_v59, %s2052_s24  ;;  %v742_v22 = vsel %vm2593_vm9, %v709_v29, 0.0 }
 0x2c0   : > { %v995_v23 = vmul.f32 %v2404_v1, %v959_v47  ;;  %v784_v52 = vmul.f32 %v2304_v34, %v742_v22 }
 0x2c1   : > { %v1024_v11 = vpop.permute.xlu0 %1023  ;;  %v814_v32 = vpop.permute.xlu1 %813 }
 0x2c2   : > { %v1007_v37 = vadd.f32 %v995_v23, %v892_v13  ;;  %v1060_v28 = vsel %vm1039_vm7, 0.0, %v1024_v11  ;;  %v830_v45 = vsel %vm827_vm2, %v812_v8, %v814_v32  ;;  %v1153_v8 = vmul.f32 %v2472_v15, %v2352_v50 }
 0x2c3   : > { %v1068_v20 = vsel %vm2540_vm4, %v1060_v28, 0.0  ;;  %v881_v41 = vmul.f32 %v2364_v54, %v830_v45  ;;  %1303 = vrot.lane.b32.xlu1 %v2378_v59, %s2053_s25 }
 0x2c4   : > { %v1104_v39 = vmul.f32 %v2440_v9, %v1068_v20 }
 0x2c5   : > { %v893_v43 = vadd.f32 %v881_v41, %v784_v52  ;;  %v1399_v44 = vpop.permute.xlu0 %1398  ;;  %v911_v51 = vpop.permute.xlu1 %910 }
 0x2c6   : > { %v1116_v7 = vadd.f32 %v1104_v39, %v1007_v37  ;;  %v927_v36 = vsel %vm924_vm5, %v909_v31, %v911_v51 }
 0x2c7   : > { %v960_v34 = vsel %vm2588_vm8, %v927_v36, 0.0  ;;  %1412 = vrot.lane.b32.xlu1 %v2378_v59, %s2049_s21  ;;  %s1920_s21 = sshll.u32 %s3194_s18, 4 }
 0x2c8   : > { %v996_v54 = vmul.f32 %v2404_v1, %v960_v34  ;;  %v1164_v6 = vadd.f32 %v1152_v0, %v1116_v7  ;;  %s406_s24 = scalar_lea.vmem %s3100_s11, %s1920_s21 }
 0x2c9   : > { %v1496_v35 = vpop.permute.xlu0 %1495  ;;  %v1026_v42 = vpop.permute.xlu1 %1025 }
 0x2ca   : > { %v1008_v58 = vadd.f32 %v996_v54, %v893_v43  ;;  %v1042_v10 = vsel %vm1039_vm7, %v1024_v11, %v1026_v42 }
 0x2cb   : > { %v1069_v48 = vsel %vm2593_vm9, %v1042_v10, 0.0  ;;  %1509 = vrot.lane.b32.xlu1 %v2378_v59, %s2051_s23 }
 0x2cc   : > { %v1105_v38 = vmul.f32 %v2440_v9, %v1069_v48 }
 0x2cd   : > { %v1183_v40 = vpop.permute.xlu0 %1182  ;;  %v1401_v61 = vpop.permute.xlu1 %1400 }
 0x2ce   : > { %v1117_v1 = vadd.f32 %v1105_v38, %v1008_v58  ;;  %v1199_v30 = vsel %vm1196_vm10, %v2744_v16, %v1183_v40  ;;  %v1217_v46 = vsel %vm1196_vm10, %v1183_v40, 0.0  ;;  %v1417_v49 = vsel %vm1414_vm11, %v1399_v44, %v1401_v61 }
 0x2cf   : > { %v1225_v13 = vsel %vm2554_vm6, %v1199_v30, 0.0  ;;  %v1226_v31 = vsel %vm2588_vm8, %v1217_v46, 0.0  ;;  %v1435_v15 = vsel %vm1414_vm11, %v1401_v61, 0.0  ;;  %v1467_v39 = vmul.f32 %v2398_v63, %v1417_v49 }
 0x2d0   : > { %v1165_v9 = vadd.f32 %v1153_v8, %v1117_v1  ;;  %v1261_v26 = vmul.f32 %v2492_v19, %v1225_v13  ;;  %v1262_v50 = vmul.f32 %v2492_v19, %v1226_v31  ;;  %v1468_v43 = vmul.f32 %v2398_v63, %v1435_v15 }
 0x2d1   : > { %v1292_v27 = vpop.permute.xlu0 %1291  ;;  %v1498_v47 = vpop.permute.xlu1 %1497  ;;  %v1602_v46 = vmul.f32 0.70710677, %v2664_v62 }
 0x2d2   : > { %v1273_v16 = vadd.f32 %v1261_v26, %v1164_v6  ;;  %v1274_v29 = vadd.f32 %v1262_v50, %v1165_v9  ;;  %v1308_v23 = vsel %vm1305_vm12, %v2758_v5, %v1292_v27  ;;  %v1326_v22 = vsel %vm1305_vm12, %v1292_v27, 0.0  ;;  %v3166_v50 = vld [vmem:[#allocation14_spill] sm:$0xff] }
 0x2d3   : > { %v1334_v11 = vsel %vm2540_vm4, %v1308_v23, 0.0  ;;  %v1335_v32 = vsel %vm2593_vm9, %v1326_v22, 0.0  ;;  %v1514_v37 = vsel %vm1511_vm13, %v1496_v35, %v1498_v47  ;;  %v1532_v19 = vsel %vm1511_vm13, %v1498_v47, 0.0 }
 0x2d4   : > { %v1370_v28 = vmul.f32 %v2512_v25, %v1334_v11  ;;  %v1371_v45 = vmul.f32 %v2512_v25, %v1335_v32  ;;  %v1540_v52 = vsel %vm2554_vm6, %v1514_v37, 0.0  ;;  %v1541_v5 = vsel %vm2588_vm8, %v1532_v19, 0.0  ;;  %v3167_v19 = vld [vmem:[#allocation4_spill] sm:$0xff] }
 0x2d5   : > { %v816_v20 = vpop.permute.xlu0 %815  ;;  %v695_v41 = vpop.permute.xlu1 %694  ;;  %v1576_v36 = vmul.f32 %v2418_v4, %v1540_v52  ;;  %v1577_v25 = vmul.f32 %v2418_v4, %v1541_v5  ;;  %2017 = verf.f32 %v1602_v46  ;;  %v1603_v27 = vmul.f32 0.70710677, %v2673_v2 }
 0x2d6   : > { %v1382_v44 = vadd.f32 %v1370_v28, %v1273_v16  ;;  %v1383_v51 = vadd.f32 %v1371_v45, %v1274_v29  ;;  %v728_v42 = vsel %vm706_vm3, 0.0, %v695_v41  ;;  %v849_v48 = vsel %vm827_vm2, 0.0, %v816_v20  ;;  %v3168_v28 = vld [vmem:[#allocation13_spill] sm:$0xff] }
 0x2d7   : > { %v743_v38 = vsel %vm2540_vm4, %v728_v42, 0.0  ;;  %v882_v1 = vmul.f32 %v2384_v60, %v849_v48  ;;  %v1154_v45 = vmul.f32 %v3168_v28, %v3167_v19  ;;  %2019 = verf.f32 %v1603_v27  ;;  %v3172_v27 = vld [vmem:[#allocation5_spill] sm:$0xff] }
 0x2d8   : > { %v1479_v0 = vadd.f32 %v1467_v39, %v1382_v44  ;;  %v1480_v7 = vadd.f32 %v1468_v43, %v1383_v51  ;;  %v785_v30 = vmul.f32 %v2362_v53, %v743_v38  ;;  %v3169_v44 = vld [vmem:[#allocation17_spill] sm:$0xff] }
 0x2d9   : > { %v913_v34 = vpop.permute.xlu0 %912  ;;  %v1403_v54 = vpop.permute.xlu1 %1402 }
 0x2da   : > { %v2834_v6 = vadd.f32 %v1576_v36, %v1479_v0  ;;  %v2836_v35 = vadd.f32 %v1577_v25, %v1480_v7  ;;  %v946_v63 = vsel %vm924_vm5, 0.0, %v913_v34  ;;  %v894_v26 = vadd.f32 %v882_v1, %v785_v30 }
 0x2db   : > { %v961_v61 = vsel %vm2554_vm6, %v946_v63, 0.0 }
 0x2dc   : > { %v997_v13 = vmul.f32 %v2412_v3, %v961_v61 }
 0x2dd   : > { %v1028_v58 = vpop.permute.xlu0 %1027  ;;  %v818_v10 = vpop.permute.xlu1 %817 }
 0x2de   : > { %v1061_v8 = vsel %vm1039_vm7, 0.0, %v1028_v58  ;;  %v1009_v47 = vadd.f32 %v997_v13, %v894_v26  ;;  %v831_v11 = vsel %vm827_vm2, %v816_v20, %v818_v10 }
 0x2df   : > { %v1070_v49 = vsel %vm2540_vm4, %v1061_v8, 0.0  ;;  %v883_v43 = vmul.f32 %v2384_v60, %v831_v11  ;;  %v2018_v38 = vpop.eup %2017 }
 0x2e0   : > { %v1106_v15 = vmul.f32 %v3166_v50, %v1070_v49 }
 0x2e1   : > { %v1185_v4 = vpop.permute.xlu0 %1184  ;;  %v915_v40 = vpop.permute.xlu1 %914 }
 0x2e2   : > { %v1118_v22 = vadd.f32 %v1106_v15, %v1009_v47  ;;  %v928_v37 = vsel %vm924_vm5, %v913_v34, %v915_v40  ;;  %v1614_v15 = vadd.f32 1.0, %v2018_v38  ;;  %v1155_v47 = vmul.f32 %v3168_v28, %v3172_v27 }
 0x2e3   : > { %v962_v7 = vsel %vm2588_vm8, %v928_v37, 0.0 }
 0x2e4   : > { %v1166_v36 = vadd.f32 %v1154_v45, %v1118_v22  ;;  %v998_v8 = vmul.f32 %v2412_v3, %v962_v7  ;;  %v3173_v45 = vld [vmem:[#allocation26_spill] sm:$0xff] }
 0x2e5   : > { %v1294_v31 = vpop.permute.xlu0 %1293  ;;  %v1030_v9 = vpop.permute.xlu1 %1029 }
 0x2e6   : > { %v1043_v52 = vsel %vm1039_vm7, %v1028_v58, %v1030_v9  ;;  %v3170_v58 = vld [vmem:[#allocation20_spill] sm:$0xff] }
 0x2e7   : > { %v1071_v42 = vsel %vm2593_vm9, %v1043_v52, 0.0 }
 0x2e8   : > { %v1107_v1 = vmul.f32 %v3166_v50, %v1071_v42  ;;  %v2020_v50 = vpop.eup %2019 }
 0x2e9   : > { %v1500_v16 = vpop.permute.xlu0 %1499  ;;  %v1187_v29 = vpop.permute.xlu1 %1186 }
 0x2ea   : > { %v1200_v23 = vsel %vm1196_vm10, %v1185_v4, %v1187_v29  ;;  %v1218_v60 = vsel %vm1196_vm10, %v1187_v29, 0.0  ;;  %v1596_v29 = vmul.f32 0.5, %v2664_v62 }
 0x2eb   : > { %v1227_v32 = vsel %vm2554_vm6, %v1200_v23, 0.0  ;;  %v1228_v30 = vsel %vm2588_vm8, %v1218_v60, 0.0 }
 0x2ec   : > { %v1263_v51 = vmul.f32 %v3169_v44, %v1227_v32  ;;  %v1264_v23 = vmul.f32 %v3169_v44, %v1228_v30 }
 0x2ed   : > { %v1296_v5 = vpop.permute.xlu1 %1295  ;;  %v697_v39 = vpop.permute.xlu0 %696 }
 0x2ee   : > { %v1309_v0 = vsel %vm1305_vm12, %v1294_v31, %v1296_v5  ;;  %v710_v20 = vsel %vm706_vm3, %v695_v41, %v697_v39  ;;  %v1275_v4 = vadd.f32 %v1263_v51, %v1166_v36  ;;  %v1327_v46 = vsel %vm1305_vm12, %v1296_v5, 0.0 }
 0x2ef   : > { %v1336_v25 = vsel %vm2540_vm4, %v1309_v0, 0.0  ;;  %v744_v34 = vsel %vm2593_vm9, %v710_v20, 0.0  ;;  %v1337_v22 = vsel %vm2593_vm9, %v1327_v46, 0.0  ;;  %v1620_v39 = vmul.f32 %v1614_v15, %v1596_v29 }
 0x2f0   : > { %v1372_v10 = vmul.f32 %v3170_v58, %v1336_v25  ;;  %v786_v63 = vmul.f32 %v2362_v53, %v744_v34  ;;  %v3171_v53 = vld [vmem:[#allocation23_spill] sm:$0xff]  ;;  %v1373_v62 = vmul.f32 %v3170_v58, %v1337_v22  ;;  %v1615_v20 = vadd.f32 1.0, %v2020_v50 }
 0x2f1   : > { %v1405_v41 = vpop.permute.xlu1 %1404  ;;  %v2877_v48 = vpop.permute.xlu0 %819  ;;  %v1597_v58 = vmul.f32 0.5, %v2673_v2  ;;  %v1604_v15 = vmul.f32 0.70710677, %v2761_v24  ;;  %v3177_v22 = vld [vmem:[#allocation11_spill] sm:$0xff] }
 0x2f2   : > { %v895_v40 = vadd.f32 %v883_v43, %v786_v63  ;;  %v1418_v61 = vsel %vm1414_vm11, %v1403_v54, %v1405_v41  ;;  %v1384_v49 = vadd.f32 %v1372_v10, %v1275_v4  ;;  %v1436_v28 = vsel %vm1414_vm11, %v1405_v41, 0.0 }
 0x2f3   : > { %v1469_v31 = vmul.f32 %v3171_v53, %v1418_v61  ;;  %v1470_v36 = vmul.f32 %v3171_v53, %v1436_v28  ;;  %v850_v63 = vsel %vm827_vm2, 0.0, %v2877_v48  ;;  %v1621_v61 = vmul.f32 %v1615_v20, %v1597_v58 }
 0x2f4   : > { %v1010_v13 = vadd.f32 %v998_v8, %v895_v40  ;;  %v3174_v8 = vld [vmem:[#allocation6_spill] sm:$0xff]  ;;  %2021 = verf.f32 %v1604_v15 }
 0x2f5   : > { %v1502_v9 = vpop.permute.xlu1 %1501  ;;  %v2886_v26 = vpop.permute.xlu0 %916  ;;  %v1481_v37 = vadd.f32 %v1469_v31, %v1384_v49 }
 0x2f6   : > { %v1119_v3 = vadd.f32 %v1107_v1, %v1010_v13  ;;  %v1515_v54 = vsel %vm1511_vm13, %v1500_v16, %v1502_v9  ;;  %v1533_v19 = vsel %vm1511_vm13, %v1502_v9, 0.0  ;;  %v947_v38 = vsel %vm924_vm5, 0.0, %v2886_v26  ;;  %v3175_v1 = vld [vmem:[#allocation7_spill] sm:$0xff] }
 0x2f7   : > { %v1542_v11 = vsel %vm2554_vm6, %v1515_v54, 0.0  ;;  %v1543_v0 = vsel %vm2588_vm8, %v1533_v19, 0.0  ;;  %v884_v30 = vmul.f32 %v3175_v1, %v850_v63  ;;  %v963_v2 = vsel %vm2554_vm6, %v947_v38, 0.0 }
 0x2f8   : > { %v1167_v32 = vadd.f32 %v1155_v47, %v1119_v3  ;;  %v1578_v52 = vmul.f32 %v3173_v45, %v1542_v11  ;;  %v1579_v41 = vmul.f32 %v3173_v45, %v1543_v0  ;;  %v3176_v3 = vld [vmem:[#allocation9_spill] sm:$0xff] }
 0x2f9   : > { %v1032_v16 = vpop.permute.xlu0 %1031  ;;  %v699_v5 = vpop.permute.xlu1 %698  ;;  %v999_v27 = vmul.f32 %v3176_v3, %v963_v2 }
 0x2fa   : > { %v1276_v43 = vadd.f32 %v1264_v23, %v1167_v32  ;;  %v1590_v44 = vadd.f32 %v1578_v52, %v1481_v37  ;;  %v729_v51 = vsel %vm706_vm3, 0.0, %v699_v5  ;;  %v1062_v53 = vsel %vm1039_vm7, 0.0, %v1032_v16 }
 0x2fb   : > { %v745_v25 = vsel %vm2540_vm4, %v729_v51, 0.0  ;;  %v1072_v50 = vsel %vm2540_vm4, %v1062_v53, 0.0  ;;  %v1605_v23 = vmul.f32 0.70710677, %v2768_v21 }
 0x2fc   : > { %v1385_v7 = vadd.f32 %v1373_v62, %v1276_v43  ;;  %v2907_v34 = vmul.f32 %v1620_v39, %v1590_v44  ;;  %v787_v4 = vmul.f32 %v3174_v8, %v745_v25  ;;  %v1108_v11 = vmul.f32 %v3177_v22, %v1072_v50  ;;  %v3178_v62 = vld [vmem:[#allocation15_spill] sm:$0xff] }
 0x2fd   : > { %v1189_v42 = vpop.permute.xlu0 %1188  ;;  %v822_v60 = vpop.permute.xlu1 %821  ;;  %v1156_v43 = vmul.f32 %v3178_v62, %v2366_v55  ;;  %2023 = verf.f32 %v1605_v23 }
 0x2fe   : > { %v1482_v10 = vadd.f32 %v1470_v36, %v1385_v7  ;;  %v896_v31 = vadd.f32 %v884_v30, %v787_v4  ;;  %v832_v45 = vsel %vm827_vm2, %v2877_v48, %v822_v60  ;;  %v3179_v7 = vld [vmem:[#allocation18_spill] sm:$0xff] }
 0x2ff   : > { %v885_v20 = vmul.f32 %v3175_v1, %v832_v45  ;;  %v2022_v1 = vpop.eup %2021 }
 0x300   : > { %v1591_v40 = vadd.f32 %v1579_v41, %v1482_v10  ;;  %v1011_v29 = vadd.f32 %v999_v27, %v896_v31  ;;  %v3180_v10 = vld [vmem:[#allocation21_spill] sm:$0xff]  ;;  %v3181_v31 = vld [vmem:[#allocation24_spill] sm:$0xff] }
 0x301   : > { %v1298_v46 = vpop.permute.xlu0 %1297  ;;  %v919_v49 = vpop.permute.xlu1 %918 }
 0x302   : > { %v2919_v13 = vmul.f32 %v1621_v61, %v1591_v40  ;;  %v1120_v52 = vadd.f32 %v1108_v11, %v1011_v29  ;;  %v929_v39 = vsel %vm924_vm5, %v2886_v26, %v919_v49  ;;  %v1598_v29 = vmul.f32 0.5, %v2761_v24 }
 0x304   : > { %v1632_v9 = vadd.f32 %v2919_v13, %v2907_v34  ;;  %v1168_v26 = vadd.f32 %v1156_v43, %v1120_v52  ;;  %v3182_v52 = vld [vmem:[#allocation28_spill] sm:$0xff] }
 0x305   : > { %v1407_v47 = vpop.permute.xlu0 %1406  ;;  %v1034_v54 = vpop.permute.xlu1 %1033 }
 0x306   : > { %1633 = vadd.xlane.f32.xlu0 %v1632_v9  ;;  %v1044_v44 = vsel %vm1039_vm7, %v1032_v16, %v1034_v54  ;;  %v1616_v54 = vadd.f32 1.0, %v2022_v1 }
 0x307   : > { %v1073_v60 = vsel %vm2593_vm9, %v1044_v44, 0.0  ;;  %v2024_v50 = vpop.eup %2023 }
 0x308   : > { %v1109_v30 = vmul.f32 %v3177_v22, %v1073_v60  ;;  %v1622_v43 = vmul.f32 %v1616_v54, %v1598_v29  ;;  %v3185_v54 = vld [vmem:[#allocation10_spill] sm:$0xff]  ;;  %v1607_v29 = vmul.f32 0.70710677, %v2836_v35 }
 0x309   : > { %v1504_v32 = vpop.permute.xlu0 %1503  ;;  %v1191_v37 = vpop.permute.xlu1 %1190 }
 0x30a   : > { %v1201_v19 = vsel %vm1196_vm10, %v1189_v42, %v1191_v37  ;;  %v964_v42 = vsel %vm2588_vm8, %v929_v39, 0.0  ;;  %v1219_v58 = vsel %vm1196_vm10, %v1191_v37, 0.0 }
 0x30b   : > { %v1229_v28 = vsel %vm2554_vm6, %v1201_v19, 0.0  ;;  %v1000_v38 = vmul.f32 %v3176_v3, %v964_v42  ;;  %v1157_v3 = vmul.f32 %v3178_v62, %v2372_v56 }
 0x30c   : > { %v1265_v36 = vmul.f32 %v3179_v7, %v1229_v28 }
 0x30d   : > { %v1300_v51 = vpop.permute.xlu1 %1299  ;;  %v701_v0 = vpop.permute.xlu0 %700 }
 0x30e   : > { %v1310_v48 = vsel %vm1305_vm12, %v1298_v46, %v1300_v51  ;;  %v711_v25 = vsel %vm706_vm3, %v699_v5, %v701_v0  ;;  %v1277_v4 = vadd.f32 %v1265_v36, %v1168_v26  ;;  %v1230_v46 = vsel %vm2588_vm8, %v1219_v58, 0.0 }
 0x30f   : > { %v1338_v55 = vsel %vm2540_vm4, %v1310_v48, 0.0  ;;  %v746_v16 = vsel %vm2593_vm9, %v711_v25, 0.0  ;;  %v1328_v49 = vsel %vm1305_vm12, %v1300_v51, 0.0  ;;  %v1266_v23 = vmul.f32 %v3179_v7, %v1230_v46 }
 0x310   : > { %v1374_v63 = vmul.f32 %v3180_v10, %v1338_v55  ;;  %v788_v41 = vmul.f32 %v3174_v8, %v746_v16  ;;  %v1339_v22 = vsel %vm2593_vm9, %v1328_v49, 0.0  ;;  %v1617_v7 = vadd.f32 1.0, %v2024_v50  ;;  %v3183_v49 = vld [vmem:[#allocation8_spill] sm:$0xff] }
 0x311   : > { %v1409_v5 = vpop.permute.xlu1 %1408  ;;  %v703_v8 = vpop.permute.xlu0 %702  ;;  %v1375_v39 = vmul.f32 %v3180_v10, %v1339_v22  ;;  %v1599_v25 = vmul.f32 0.5, %v2768_v21 }
 0x312   : > { %v897_v40 = vadd.f32 %v885_v20, %v788_v41  ;;  %v1419_v61 = vsel %vm1414_vm11, %v1407_v47, %v1409_v5  ;;  %v1386_v2 = vadd.f32 %v1374_v63, %v1277_v4  ;;  %v730_v21 = vsel %vm706_vm3, 0.0, %v703_v8 }
 0x313   : > { %v1471_v9 = vmul.f32 %v3181_v31, %v1419_v61  ;;  %v1623_v16 = vmul.f32 %v1617_v7, %v1599_v25  ;;  %v3187_v25 = vld [vmem:[#allocation19_spill] sm:$0xff] }
 0x314   : > { %v1012_v53 = vadd.f32 %v1000_v38, %v897_v40 }
 0x315   : > { %v1506_v15 = vpop.permute.xlu1 %1505  ;;  %v1483_v19 = vadd.f32 %v1471_v9, %v1386_v2  ;;  %v824_v51 = vpop.permute.xlu0 %823  ;;  %v747_v9 = vsel %vm2540_vm4, %v730_v21, 0.0 }
 0x316   : > { %v1121_v27 = vadd.f32 %v1109_v30, %v1012_v53  ;;  %v1516_v47 = vsel %vm1511_vm13, %v1504_v32, %v1506_v15  ;;  %v1534_v45 = vsel %vm1511_vm13, %v1506_v15, 0.0  ;;  %v1437_v32 = vsel %vm1414_vm11, %v1409_v5, 0.0 }
 0x317   : > { %v1544_v11 = vsel %vm2554_vm6, %v1516_v47, 0.0  ;;  %v1545_v44 = vsel %vm2588_vm8, %v1534_v45, 0.0  ;;  %v1472_v20 = vmul.f32 %v3181_v31, %v1437_v32  ;;  %v851_v61 = vsel %vm827_vm2, 0.0, %v824_v51  ;;  %v3186_v32 = vld [vmem:[#allocation16_spill] sm:$0xff] }
 0x318   : > { %v1169_v37 = vadd.f32 %v1157_v3, %v1121_v27  ;;  %v1580_v56 = vmul.f32 %v3182_v52, %v1544_v11  ;;  %v1581_v26 = vmul.f32 %v3182_v52, %v1545_v44  ;;  %v1606_v31 = vmul.f32 0.70710677, %v2834_v6  ;;  %v3184_v3 = vld [vmem:[#allocation12_spill] sm:$0xff] }
 0x319   : > { %v1193_v28 = vpop.permute.xlu1 %1192  ;;  %v921_v60 = vpop.permute.xlu0 %920  ;;  %v886_v27 = vmul.f32 %v3183_v49, %v851_v61  ;;  %v789_v11 = vmul.f32 %v3184_v3, %v747_v9 }
 0x31a   : > { %v1278_v24 = vadd.f32 %v1266_v23, %v1169_v37  ;;  %v1592_v62 = vadd.f32 %v1580_v56, %v1483_v19  ;;  %v948_v40 = vsel %vm924_vm5, 0.0, %v921_v60  ;;  %2025 = verf.f32 %v1606_v31 }
 0x31b   : > { %v898_v56 = vadd.f32 %v886_v27, %v789_v11  ;;  %2027 = verf.f32 %v1607_v29  ;;  %v1600_v11 = vmul.f32 0.5, %v2834_v6  ;;  %v2056_v6 = vmov 0.0  }
 0x31c   : > { %v1387_v0 = vadd.f32 %v1375_v39, %v1278_v24  ;;  %v2978_v36 = vmul.f32 %v1622_v43, %v1592_v62  ;;  %1937 = vmatprep.mubr.msk.f32.mxu0 %vm2055_vm14, %v2056_v6 }
 0x31d   : > { %v1302_v48 = vpop.permute.xlu1 %1301  ;;  %v1036_v38 = vpop.permute.xlu0 %1035 }
 0x31e   : > { %v1484_v42 = vadd.f32 %v1472_v20, %v1387_v0  ;;  %v1063_v46 = vsel %vm1039_vm7, 0.0, %v1036_v38 }
 0x31f   : > { %v1074_v23 = vsel %vm2540_vm4, %v1063_v46, 0.0  ;;  %v2054_v46 = vmov 0.0|0.0  }
 0x320   : > { %v1593_v55 = vadd.f32 %v1581_v26, %v1484_v42  ;;  %v1110_v39 = vmul.f32 %v3186_v32, %v1074_v23  ;;  %v1159_v42 = vmul.f32 %v3187_v25, %v2378_v59  ;;  %1946 = vmatprep.subr.bf16.mxu0 %v2054_v46 }
 0x321   : > { %v705_v58 = vpop.permute.xlu1 %704 }
 0x322   : > { %v2982_v10 = vmul.f32 %v1623_v16, %v1593_v55  ;;  %v712_v5 = vsel %vm706_vm3, %v703_v8, %v705_v58  ;;  %v965_v8 = vsel %vm2554_vm6, %v948_v40, 0.0 }
 0x323   : > { %v748_v1 = vsel %vm2593_vm9, %v712_v5, 0.0  ;;  %v1001_v37 = vmul.f32 %v3185_v54, %v965_v8 }
 0x324   : > { %v1635_v63 = vadd.f32 %v2982_v10, %v2978_v36  ;;  %v790_v47 = vmul.f32 %v3184_v3, %v748_v1  ;;  %v3189_v1 = vld [vmem:[#allocation25_spill] sm:$0xff] }
 0x325   : > { %v826_v41 = vpop.permute.xlu1 %825 }
 0x326   : > { %1636 = vadd.xlane.f32.xlu1 %v1635_v63  ;;  %v833_v4 = vsel %vm827_vm2, %v824_v51, %v826_v41  ;;  %v1013_v51 = vadd.f32 %v1001_v37, %v898_v56  ;;  %v3188_v41 = vld [vmem:[#allocation22_spill] sm:$0xff]  ;;  %v1601_v37 = vmul.f32 0.5, %v2836_v35 }
 0x327   : > { %v887_v2 = vmul.f32 %v3183_v49, %v833_v4  ;;  %v2026_v49 = vpop.eup %2025 }
 0x328   : > { %v1122_v16 = vadd.f32 %v1110_v39, %v1013_v51  ;;  %v2028_v33 = vpop.eup %2027  ;;  %v1618_v23 = vadd.f32 1.0, %v2026_v49 }
 0x329   : > { %v923_v30 = vpop.permute.xlu1 %922  ;;  %v899_v19 = vadd.f32 %v887_v2, %v790_v47 }
 0x32a   : > { %v930_v53 = vsel %vm924_vm5, %v921_v60, %v923_v30  ;;  %v1158_v60 = vmul.f32 %v3187_v25, %v2374_v57 }
 0x32b   : > { %v966_v15 = vsel %vm2588_vm8, %v930_v53, 0.0 }
 0x32c   : > { %v1002_v50 = vmul.f32 %v3185_v54, %v966_v15  ;;  %v1170_v61 = vadd.f32 %v1158_v60, %v1122_v16 }
 0x32d   : > { %v1038_v22 = vpop.permute.xlu1 %1037 }
 0x32e   : > { %v1045_v45 = vsel %vm1039_vm7, %v1036_v38, %v1038_v22  ;;  %v1014_v24 = vadd.f32 %v1002_v50, %v899_v19  ;;  %v1570_v43 = vpop.permute.xlu0 %1569  ;;  %v1619_v22 = vadd.f32 1.0, %v2028_v33 }
 0x32f   : > { %v1075_v52 = vsel %vm2593_vm9, %v1045_v45, 0.0 }
 0x330   : > { %v1111_v62 = vmul.f32 %v3186_v32, %v1075_v52  ;;  %v1625_v51 = vmul.f32 %v1619_v22, %v1601_v37 }
 0x331   : > { %v1195_v44 = vpop.permute.xlu1 %1194 }
 0x332   : > { %v1123_v0 = vadd.f32 %v1111_v62, %v1014_v24  ;;  %v1202_v20 = vsel %vm1196_vm10, %v1193_v28, %v1195_v44  ;;  %v1220_v7 = vsel %vm1196_vm10, %v1195_v44, 0.0  ;;  %v1411_v4 = vpop.permute.xlu0 %1410  ;;  %v1624_v44 = vmul.f32 %v1618_v23, %v1600_v11 }
 0x333   : > { %v1231_v26 = vsel %vm2554_vm6, %v1202_v20, 0.0  ;;  %v1232_v55 = vsel %vm2588_vm8, %v1220_v7, 0.0 }
 0x334   : > { %v1171_v58 = vadd.f32 %v1159_v42, %v1123_v0  ;;  %v1267_v5 = vmul.f32 %v3188_v41, %v1231_v26  ;;  %v1268_v28 = vmul.f32 %v3188_v41, %v1232_v55  ;;  %v1651_v41 = vld [vmem:[%s3098_s9] sm:$0xff] }
 0x335   : > { %v1304_v63 = vpop.permute.xlu1 %1303 }
 0x336   : > { %v1311_v38 = vsel %vm1305_vm12, %v1302_v48, %v1304_v63  ;;  %v1329_v59 = vsel %vm1305_vm12, %v1304_v63, 0.0  ;;  %v1279_v53 = vadd.f32 %v1267_v5, %v1170_v61  ;;  %v1280_v48 = vadd.f32 %v1268_v28, %v1171_v58  ;;  %v1508_v47 = vpop.permute.xlu0 %1507  ;;  %v1647_v58 = vld [vmem:[%s3097_s8 + $0x8] sm:$0xf]  ;;  %v1653_v61 = vld [vmem:[%s3098_s9 + $0x10] sm:$0xff] }
 0x337   : > { %v1340_v21 = vsel %vm2540_vm4, %v1311_v38, 0.0  ;;  %v1341_v40 = vsel %vm2593_vm9, %v1329_v59, 0.0  ;;  %v1650_v63 = vunpack.c.l.bf16 %v1647_v58  ;;  %v1652_v59 = vld [vmem:[%s3098_s9 + $0x8] sm:$0xff] }
 0x338   : > { %v1376_v57 = vmul.f32 %v3189_v1, %v1340_v21  ;;  %v1377_v30 = vmul.f32 %v3189_v1, %v1341_v40 }
 0x339   : > { %v1413_v2 = vpop.permute.xlu1 %1412 }
 0x33a   : > { %v1420_v31 = vsel %vm1414_vm11, %v1411_v4, %v1413_v2  ;;  %v1438_v9 = vsel %vm1414_vm11, %v1413_v2, 0.0  ;;  %v1388_v8 = vadd.f32 %v1376_v57, %v1279_v53  ;;  %v1389_v15 = vadd.f32 %v1377_v30, %v1280_v48 }
 0x33b   : > { %v1473_v27 = vmul.f32 %v3190_v18, %v1420_v31  ;;  %v1474_v3 = vmul.f32 %v3190_v18, %v1438_v9 }
 0x33d   : > { %v1510_v54 = vpop.permute.xlu1 %1509  ;;  %v1485_v52 = vadd.f32 %v1473_v27, %v1388_v8  ;;  %v1486_v56 = vadd.f32 %v1474_v3, %v1389_v15 }
 0x33e   : > { %v1517_v50 = vsel %vm1511_vm13, %v1508_v47, %v1510_v54  ;;  %v1535_v29 = vsel %vm1511_vm13, %v1510_v54, 0.0  ;;  %v3192_v54 = vld [vmem:[#allocation3_spill] sm:$0xff] }
 0x33f   : > { %v1546_v19 = vsel %vm2554_vm6, %v1517_v50, 0.0  ;;  %v1547_v45 = vsel %vm2588_vm8, %v1535_v29, 0.0 }
 0x340   : > { %v1582_v32 = vmul.f32 %v1570_v43, %v1546_v19  ;;  %v1583_v39 = vmul.f32 %v1570_v43, %v1547_v45  ;;  %v1922_v43 = vld [vmem:[%s3097_s8] sm:$0xff]  }
 0x341   : > { %v1923_v55 = vunpack.c.l.bf16 %v1922_v43  ;;  %v1924_v60 = vunpack.c.h.bf16 %v1922_v43 }
 0x342   : > { %v1594_v24 = vadd.f32 %v1582_v32, %v1485_v52  ;;  %v1595_v62 = vadd.f32 %v1583_v39, %v1486_v56 }
 0x344   : > { %v1630_v0 = vmul.f32 %v1624_v44, %v1594_v24  ;;  %v1631_v20 = vmul.f32 %v1625_v51, %v1595_v62 }
 0x346   : > { %v1638_v7 = vadd.f32 %v1631_v20, %v1630_v0 }
 0x348   : > { %1639 = vadd.xlane.f32.xlu0 %v1638_v7 }
 0x393   : > { %v1634_v12 = vpop.xlane.xlu0 %1633 }
 0x394   : > { %v1642_v17 = vmul.f32 0.00390625, %v1634_v12 }
 0x3b3   : > { %v1637_v35 = vpop.xlane.xlu1 %1636 }
 0x3b4   : > { %v1643_v25 = vmul.f32 0.00390625, %v1637_v35 }
 0x3b6   : > { %v1947_v42 = vpack.c.bf16 %v1643_v25, %v1642_v17 }
 0x3b8   : > { %1948 = vmatpush3.bf16.msra.mxu0 %v1947_v42 }
 0x3b9   : > { %1935 = vmatprep.subr.mxu0 %v2056_v6 }
 0x3d5   : > { %v1640_v26 = vpop.xlane.xlu0 %1639 }
 0x3d6   : > { %v1644_v16 = vmul.f32 0.00390625, %v1640_v26 }
 0x3d8   : > { %1936 = vmatpush3.msra.mxu0 %v1644_v16 }
 0x3d9   : > { %1938 = vmatmul.mubr.msk.f32.vlgmr.msra.gmra.mrb[4].mxu0 %vm1654_vm15, %v1923_v55 }
 0x3da   : > { %1940 = vmatprep.mubr.msk.f32.mxu0 %vm2055_vm14, %v2056_v6 }
 0x3dd   : > { %1941 = vmatmul.mubr.msk.f32.gmra.mrb[6].mxu0 %vm1654_vm15, %v1924_v60 }
 0x3de   : > { %1943 = vmatprep.mubr.msk.f32.mxu0 %vm2055_vm14, %v2056_v6 }
 0x3e1   : > { %1944 = vmatmul.mubr.msk.f32.gmra.mrb[8].mxu0 %vm1654_vm15, %v1650_v63 }
 0x3e2   : > { %1811 = vmatprep.mubr.bf16.mxu0 %v3165_v14 }
 0x4ac   : > { %v1730_v5 = vpop.f32.mrb[4].mxu0 }
 0x4ad   : > { %v1731_v28 = vadd.f32 %v1730_v5, %v1651_v41  ;;  %v1939_v38 = vpop.f32.mrb[5].mxu0 }
 0x4af   : > { %1746 = vperm.xlu0 %2008, %v1731_v28  }
 0x4b0   : > { %v1735_v4 = vpop.f32.mrb[6].mxu0 }
 0x4b1   : > { %v1736_v21 = vadd.f32 %v1735_v4, %v1652_v59  ;;  %v1942_v40 = vpop.f32.mrb[7].mxu0 }
 0x4b3   : > { %1751 = vperm.xlu1 %2009, %v1736_v21  }
 0x4b4   : > { %v1740_v14 = vpop.f32.mrb[8].mxu0 }
 0x4b5   : > { %v1741_v1 = vadd.f32 %v1740_v14, %v1653_v61  ;;  %v1945_v57 = vpop.f32.mrb[9].mxu0 }
 0x4b7   : > { %1756 = vperm.xlu1 %2009, %v1741_v1  }
 0x52e   : > { %v1747_v30 = vpop.permute.xlu0 %1746 }
 0x52f   : > { %v1759_v49 = vmul.f32 %v1747_v30, %v2907_v34  ;;  %v1760_v2 = vmul.f32 %v1747_v30, %v2919_v13  ;;  %v1765_v34 = vld [vmem:[%s3099_s10] sm:$0xf] }
 0x532   : > { %v1752_v46 = vpop.permute.xlu1 %1751 }
 0x533   : > { %v1761_v53 = vmul.f32 %v1752_v46, %v2978_v36  ;;  %v1762_v48 = vmul.f32 %v1752_v46, %v2982_v10  ;;  %v3191_v36 = vld [vmem:[#allocation2_spill] sm:$0xff] }
 0x535   : > { %v1766_v31 = vpack.c.bf16 %v1761_v53, %v1759_v49  ;;  %v1767_v9 = vpack.c.bf16 %v1762_v48, %v1760_v2 }
 0x536   : > { %v1757_v33 = vpop.permute.xlu1 %1756 }
 0x537   : > { %v1763_v8 = vmul.f32 %v1757_v33, %v1630_v0  ;;  %v1764_v15 = vmul.f32 %v1757_v33, %v1631_v20  ;;  %1779 = vmatprep.subr.bf16.mxu0 %v1767_v9 }
 0x538   : > { %1780 = vmatpush1.bf16.msra.mxu0 %v1766_v31 }
 0x539   : > { %v1768_v18 = vpack.c.bf16 %v1763_v8, %v1763_v8  ;;  %v1769_v27 = vpack.c.bf16 %v1764_v15, %v1764_v15 }
 0x53b   : > { %v1774_v3 = vsel %vm418_vm0, %v1768_v18, 0  ;;  %1914 = vmatprep.subr.msk.bf16.mxu0 %vm418_vm0, %v1769_v27 }
 0x53c   : > { %1782 = vmatpush1.bf16.msra.mxu0 %v1774_v3 }
 0x53f   : > { %1915 = vmatmul.mubr.msk.bf16.vlgmr.msra.gmra.mrb[12].mxu0 %vm1654_vm15, %v1765_v34 }
 0x612   : > { %v1813_v13 = vpop.f32.mrb[12].mxu0 }
 0x613   : > { %v1820_v10 = vadd.f32 %v1813_v13, %v3191_v36  ;;  %v1815_v47 = vpop.f32.mrb[13].mxu0 }
 0x614   : > { %v1821_v50 = vadd.f32 %v1815_v47, %v3192_v54  ;;  %v1817_v29 = vpop.f32.mrb[14].mxu0 }
 0x615   : > { %1822 = vst [vmem:[%s406_s24] sm:$0xff] %v1820_v10  ;;  %v1818_v23 = vpop.f32.mrb[15].mxu0 }
 0x616   : > { %1823 = vst [vmem:[%s406_s24 + $0x8] sm:$0xff] %v1821_v50 }
 0x617 PF: > { %s21_s17 = sadd.s32 1, %s2035_s17  }
 0x618   : > { %p18_p4 = scmp.ge.s32.totalorder %s21_s17, 4  }
 0x61a   :  { %20 = sbr.rel (!%p18_p4) target bundleno = 1 (0x1), region = 97 }

</bundles_post_ra>
